<compile_context>
chip_gen: v7x
topology: tpu7x:2x2x1
jax: 0.10.0
libtpu: 0.0.40
codegen_flags: <defaults>
</compile_context>

<pallas_src>
import functools
from math import sqrt

import jax
import jax.numpy as jnp
from jax.experimental import pallas as pl
from jax.experimental.pallas import tpu as pltpu


def _round_up(x, m):
    return (x + m - 1) // m * m


# ----------------------------------------------------------------------------
# Fused kernel: one grid step == one batch element, whole plane in VMEM.
# Flat layout: padded plane (C, Sp) row-flattened with row stride Wp; flat
# output index q = h*Wp + w, tap (i, j) is a pure lane shift of d = i*Wp + j.
# ----------------------------------------------------------------------------
def _fused_residual_block_kernel(masks_ref, x_ref, w1_ref, w2_ref, aff_ref,
                                 o_ref, xstk_ref, ybuf_ref, ypad_ref,
                                 *, H, W, Wp, eps):
    C = o_ref.shape[0]
    PX = o_ref.shape[1]            # 128-aligned compute/store width (>= H*Wp)
    L1 = H * Wp                    # span of the column-padded intermediate
    Sp = (H + 2) * Wp              # span of a fully reflect-padded plane
    SX = x_ref.shape[1]            # = 2*Wp + 2 + PX (input plane + zero tail)
    cdt = xstk_ref.dtype           # MXU operand dtype (f32 or bf16)
    inv_n = 1.0 / float(H * W)
    GUARD = 8

    valid = masks_ref[0:1, :]      # 1.0 at real output positions, else 0.0

    def stack_taps(src_ref):
        # im2col into the shared VMEM scratch: row block t = tap (t//3, t%3)
        for t in range(9):
            d = (t // 3) * Wp + (t % 3)
            xstk_ref[t * C:(t + 1) * C, :] = src_ref[:, d:d + PX].astype(cdt)

    def conv(w_ref):
        # single MXU matmul, contraction over 9*Cin (accumulate in f32)
        return jnp.dot(w_ref[...], xstk_ref[...],
                       preferred_element_type=jnp.float32)

    def instance_norm(acc, g, b):
        am = acc * valid                               # masked plane, reused
        s1 = jnp.sum(am, axis=1, keepdims=True)
        s2 = jnp.sum(am * am, axis=1, keepdims=True)
        mean = s1 * inv_n
        var = jnp.maximum(s2 * inv_n - mean * mean, 0.0)
        scale = g * jax.lax.rsqrt(var + eps)           # per-channel scale
        shift = b - mean * scale                       # per-channel shift
        return acc * scale + shift

    # ---- stage 1: conv1 -> IN1 -> ReLU (no bias: cancelled by IN) -----------
    stack_taps(x_ref)
    acc1 = conv(w1_ref)
    y1 = jnp.maximum(instance_norm(acc1, aff_ref[:, 0:1], aff_ref[:, 1:2]), 0.0)

    # ---- in-VMEM reflect re-pad of y1 (no HBM round trip) -------------------
    # 1) column reflect (width L1): y1c[q] = y1[q-1] interior,
    #    y1[q+1] at left pad col, y1[q-3] at right pad col.
    zeros_g = jnp.zeros((C, GUARD), jnp.float32)
    ybuf_ref[:, 0:GUARD] = zeros_g
    ybuf_ref[:, GUARD:GUARD + PX] = y1
    ybuf_ref[:, GUARD + PX:GUARD + PX + GUARD] = zeros_g
    a_int = ybuf_ref[:, GUARD - 1:GUARD - 1 + L1]      # y1[q-1]
    a_lft = ybuf_ref[:, GUARD + 1:GUARD + 1 + L1]      # y1[q+1]
    a_rgt = ybuf_ref[:, GUARD - 3:GUARD - 3 + L1]      # y1[q-3]
    y1c = (a_int * masks_ref[1:2, :L1]
           + a_lft * masks_ref[2:3, :L1]
           + a_rgt * masks_ref[3:4, :L1])
    # 2) row reflect: top pad row = row 1, bottom pad row = row H-2.
    ypad_ref[:, 0:Wp] = y1c[:, Wp:2 * Wp]
    ypad_ref[:, Wp:Wp + L1] = y1c
    ypad_ref[:, Wp + L1:Sp] = y1c[:, (H - 2) * Wp:(H - 1) * Wp]
    ypad_ref[:, Sp:SX] = jnp.zeros((C, SX - Sp), jnp.float32)  # finite tail

    # ---- stage 2: conv2 -> IN2 -> + residual (f32) --------------------------
    stack_taps(ypad_ref)
    acc2 = conv(w2_ref)
    y2 = instance_norm(acc2, aff_ref[:, 2:3], aff_ref[:, 3:4])
    y2 = y2 + x_ref[:, Wp + 1:Wp + 1 + PX].astype(jnp.float32)  # residual
    o_ref[...] = y2.astype(o_ref.dtype)


# ----------------------------------------------------------------------------
# Whole-block forward (jit'ed: only the input pad and final un-flatten remain
# as XLA glue around the single pallas_call).
# ----------------------------------------------------------------------------
@functools.partial(jax.jit, static_argnames=("eps",))
def _residual_block_forward(x, w1s, w2s, aff, *, eps):
    N, C, H, W = x.shape
    Hp, Wp = H + 2, W + 2
    Sp = Hp * Wp
    P = (H - 1) * Wp + W           # true flat output span
    L1 = H * Wp
    PX = _round_up(L1, 128)        # lane-aligned compute/output width
    SX = 2 * Wp + 2 + PX           # input plane width (pad span + zero tail)

    # reflect pad + row-flatten + zero tail up to SX
    xp = jnp.pad(x, ((0, 0), (0, 0), (1, 1), (1, 1)), mode="reflect")
    x_flat = jnp.pad(xp.reshape(N, C, Sp), ((0, 0), (0, 0), (0, SX - Sp)))

    # grid-invariant masks, precomputed once (no per-step modulo in-kernel)
    q = jnp.arange(PX, dtype=jnp.int32)
    col = q % Wp
    in_p = q < P
    in_l = q < L1
    m_valid = (in_p & (col < W)).astype(jnp.float32)
    m_c0 = (in_l & (col == 0)).astype(jnp.float32)
    m_cr = (in_l & (col == Wp - 1)).astype(jnp.float32)
    m_int = in_l.astype(jnp.float32) - m_c0 - m_cr
    masks = jnp.stack([m_valid, m_int, m_c0, m_cr], axis=0)     # (4, PX)

    kernel = functools.partial(_fused_residual_block_kernel,
                               H=H, W=W, Wp=Wp, eps=eps)

    cdt = w1s.dtype
    itm = jnp.dtype(x.dtype).itemsize
    est_vmem = 4 * (2 * C * SX          # input block (double buffered)
                    + 2 * C * PX        # output block (double buffered)
                    + 9 * C * PX        # im2col scratch (shared by both stages)
                    + C * (PX + 16)     # guard buffer
                    + C * SX            # padded intermediate
                    + 4 * PX + 18 * C * C + 4 * C)
    try:
        info = pltpu.get_tpu_info()
        vmem_cap = int(getattr(info, "vmem_capacity_bytes", 64 * 1024 * 1024))
    except Exception:
        vmem_cap = 64 * 1024 * 1024
    vmem_limit = int(min(vmem_cap, max(16 * 1024 * 1024, 2 * est_vmem)))

    cost = pl.CostEstimate(
        flops=2 * N * (2 * 9 * C * C * PX) + 30 * N * C * PX,
        transcendentals=2 * N * C,
        bytes_accessed=N * C * (SX + PX) * itm
                       + (4 * PX + 18 * C * C + 4 * C) * 4,
    )

    out_flat = pl.pallas_call(
        kernel,
        out_shape=jax.ShapeDtypeStruct((N, C, PX), x.dtype),
        grid_spec=pltpu.PrefetchScalarGridSpec(
            num_scalar_prefetch=0,
            grid=(N,),
            in_specs=[
                pl.BlockSpec((4, PX), lambda n: (0, 0)),            # masks
                pl.BlockSpec((None, C, SX), lambda n: (n, 0, 0)),   # x plane
                pl.BlockSpec((C, 9 * C), lambda n: (0, 0)),         # w1 stacked
                pl.BlockSpec((C, 9 * C), lambda n: (0, 0)),         # w2 stacked
                pl.BlockSpec((C, 4), lambda n: (0, 0)),             # affine
            ],
            out_specs=pl.BlockSpec((None, C, PX), lambda n: (n, 0, 0)),
            scratch_shapes=[
                pltpu.VMEM((9 * C, PX), cdt),          # im2col (both stages)
                pltpu.VMEM((C, PX + 16), jnp.float32),  # guard buffer
                pltpu.VMEM((C, SX), jnp.float32),       # reflect-padded y1
            ],
        ),
        compiler_params=pltpu.CompilerParams(
            dimension_semantics=("parallel",),
            vmem_limit_bytes=vmem_limit),
        cost_estimate=cost,
    )(masks, x_flat, w1s, w2s, aff)

    # strided flat layout -> dense NCHW (only remaining XLA-side reshape)
    return out_flat[:, :, :L1].reshape(N, C, H, Wp)[:, :, :, :W]


class ResidualBlock:
    """JAX/Pallas port of the PyTorch ResidualBlock (channels -> channels, k=3, s=1)."""

    KERNEL_SIZE = 3

    def __init__(self, channels, *, key=None, dtype=jnp.float32,
                 compute_dtype=None):
        # compute_dtype=jnp.bfloat16 halves MXU-operand bytes (weights + im2col
        # scratch) for v5e/v6e/v7x; all norm math and the residual stay in f32.
        self.channels = channels
        self.eps = 1e-5
        cdt = dtype if compute_dtype is None else compute_dtype

        if key is None:
            key = jax.random.PRNGKey(0)
        k1w, k1b, k2w, k2b = jax.random.split(key, 4)
        k = self.KERNEL_SIZE
        fan_in = channels * k * k
        bound = 1.0 / sqrt(fan_in)

        def init_conv(kw, kb):
            w = jax.random.uniform(kw, (channels, channels, k, k),
                                   minval=-bound, maxval=bound, dtype=dtype)
            b = jax.random.uniform(kb, (channels,),
                                   minval=-bound, maxval=bound, dtype=dtype)
            return w, b

        self.w1, self.b1 = init_conv(k1w, k1b)   # PyTorch Conv2d layout (O, I, KH, KW)
        self.w2, self.b2 = init_conv(k2w, k2b)
        # InstanceNorm2d(affine=True) defaults: weight = 1, bias = 0.
        self.in1_gamma = jnp.ones((channels,), dtype)
        self.in1_beta = jnp.zeros((channels,), dtype)
        self.in2_gamma = jnp.ones((channels,), dtype)
        self.in2_beta = jnp.zeros((channels,), dtype)

        # Weights re-laid-out as (Cout, 9*Cin): column t*Cin+ci = w[co,ci,i,j],
        # t = i*3 + j -> a single stacked-tap MXU matmul per conv.
        def stack_w(w):
            return jnp.transpose(w, (0, 2, 3, 1)).reshape(
                channels, k * k * channels).astype(cdt)

        self._w1_stk = stack_w(self.w1)
        self._w2_stk = stack_w(self.w2)
        # gamma1, beta1, gamma2, beta2 packed into one (C, 4) constant block.
        self._aff = jnp.stack([self.in1_gamma, self.in1_beta,
                               self.in2_gamma, self.in2_beta],
                              axis=1).astype(jnp.float32)
        # NOTE: conv biases b1/b2 are mathematically cancelled by the
        # InstanceNorm mean subtraction, so the kernel does not use them
        # (kept as attributes for parity with the PyTorch module).

    def __call__(self, x_nchw):
        return _residual_block_forward(x_nchw, self._w1_stk, self._w2_stk,
                                       self._aff, eps=self.eps)


# ----------------------------------------------------------------------------
# Pure-JAX reference (mirrors the PyTorch module, incl. conv biases)
# ----------------------------------------------------------------------------
def _reference_forward(x, w1, b1, g1, be1, w2, b2, g2, be2, eps):
    def conv(h, w, b):
        hp = jnp.pad(h, ((0, 0), (0, 0), (1, 1), (1, 1)), mode="reflect")
        out = jax.lax.conv_general_dilated(
            hp, w, window_strides=(1, 1), padding="VALID",
            dimension_numbers=("NCHW", "OIHW", "NCHW"),
            precision=jax.lax.Precision.HIGHEST)
        return out + b[None, :, None, None]

    def inorm(h, g, be):
        m = jnp.mean(h, axis=(2, 3), keepdims=True)
        v = jnp.mean((h - m) ** 2, axis=(2, 3), keepdims=True)
        return (g[None, :, None, None] * (h - m) * jax.lax.rsqrt(v + eps)
                + be[None, :, None, None])

    y = jax.nn.relu(inorm(conv(x, w1, b1), g1, be1))
    y = inorm(conv(y, w2, b2), g2, be2)
    return y + x


if __name__ == "__main__":
    key = jax.random.PRNGKey(0)
    k_x, k_p = jax.random.split(key)

    # Small shapes: batch=2, channels=4, spatial=16x16
    x = jax.random.normal(k_x, (2, 4, 16, 16), dtype=jnp.float32)
    block = ResidualBlock(channels=4, key=k_p)

    out = jax.block_until_ready(block(x))
    assert out.shape == (2, 4, 16, 16), out.shape

    ref = jax.block_until_ready(_reference_forward(
        x, block.w1, block.b1, block.in1_gamma, block.in1_beta,
        block.w2, block.b2, block.in2_gamma, block.in2_beta, block.eps))
    # f32 path typically lands well below 1e-3; the bound only guards against
    # MXU default-precision variation across TPU generations.
    max_err = float(jnp.max(jnp.abs(out - ref)))
    assert max_err < 1e-2, f"max abs error vs reference: {max_err}"

    print("KERNEL_OK")
</pallas_src>

<mosaic_0001>
module attributes {stable_mosaic.version = 11 : i64} {
  func.func @_fused_residual_block_kernel(%arg0: i32, %arg1: memref<4x384xf32, #tpu.memory_space<vmem>>, %arg2: memref<1x4x422xf32, #tpu.memory_space<vmem>>, %arg3: memref<4x36xf32, #tpu.memory_space<vmem>>, %arg4: memref<4x36xf32, #tpu.memory_space<vmem>>, %arg5: memref<4x4xf32, #tpu.memory_space<vmem>>, %arg6: memref<1x4x384xf32, #tpu.memory_space<vmem>>, %arg7: memref<36x384xf32, #tpu.memory_space<vmem>>, %arg8: memref<4x400xf32, #tpu.memory_space<vmem>>, %arg9: memref<4x422xf32, #tpu.memory_space<vmem>>) attributes {dimension_semantics = [#tpu.dimension_semantics<parallel>], iteration_bounds = array<i64: 2>, scalar_prefetch = 0 : i64, scratch_operands = 3 : i64, tpu.core_type = #tpu.core_type<tc>, window_params = [{pipeline_mode = #tpu.pipeline_mode<synchronous>, transform_indices = @transform_0, window_bounds = array<i64: 4, 384>}, {transform_indices = @transform_1, window_bounds = array<i64: 1, 4, 422>}, {pipeline_mode = #tpu.pipeline_mode<synchronous>, transform_indices = @transform_2, window_bounds = array<i64: 4, 36>}, {pipeline_mode = #tpu.pipeline_mode<synchronous>, transform_indices = @transform_3, window_bounds = array<i64: 4, 36>}, {pipeline_mode = #tpu.pipeline_mode<synchronous>, transform_indices = @transform_4, window_bounds = array<i64: 4, 4>}, {transform_indices = @transform_5, window_bounds = array<i64: 1, 4, 384>}]} {
    %c0 = arith.constant 0 : index
    %c0_0 = arith.constant 0 : index
    %0 = vector.load %arg1[%c0, %c0_0] : memref<4x384xf32, #tpu.memory_space<vmem>>, vector<1x384xf32>
    %c0_1 = arith.constant 0 : index
    %c0_2 = arith.constant 0 : index
    %c0_3 = arith.constant 0 : index
    %1 = vector.load %arg2[%c0_1, %c0_2, %c0_3] : memref<1x4x422xf32, #tpu.memory_space<vmem>>, vector<1x4x384xf32>
    %2 = vector.shape_cast %1 : vector<1x4x384xf32> to vector<4x384xf32>
    %c0_4 = arith.constant 0 : index
    %c0_5 = arith.constant 0 : index
    %3 = vector.load %arg7[%c0_4, %c0_5] : memref<36x384xf32, #tpu.memory_space<vmem>>, vector<4x384xf32>
    tpu.vector_store %arg7[%c0_4, %c0_5], %2 {strides = array<i32>} : memref<36x384xf32, #tpu.memory_space<vmem>>, vector<4x384xf32>,
    %c0_6 = arith.constant 0 : index
    %c0_7 = arith.constant 0 : index
    %c1 = arith.constant 1 : index
    %4 = vector.load %arg2[%c0_6, %c0_7, %c1] : memref<1x4x422xf32, #tpu.memory_space<vmem>>, vector<1x4x384xf32>
    %5 = vector.shape_cast %4 : vector<1x4x384xf32> to vector<4x384xf32>
    %c4 = arith.constant 4 : index
    %c0_8 = arith.constant 0 : index
    %6 = vector.load %arg7[%c4, %c0_8] : memref<36x384xf32, #tpu.memory_space<vmem>>, vector<4x384xf32>
    tpu.vector_store %arg7[%c4, %c0_8], %5 {strides = array<i32>} : memref<36x384xf32, #tpu.memory_space<vmem>>, vector<4x384xf32>,
    %c0_9 = arith.constant 0 : index
    %c0_10 = arith.constant 0 : index
    %c2 = arith.constant 2 : index
    %7 = vector.load %arg2[%c0_9, %c0_10, %c2] : memref<1x4x422xf32, #tpu.memory_space<vmem>>, vector<1x4x384xf32>
    %8 = vector.shape_cast %7 : vector<1x4x384xf32> to vector<4x384xf32>
    %c8 = arith.constant 8 : index
    %c0_11 = arith.constant 0 : index
    %9 = vector.load %arg7[%c8, %c0_11] : memref<36x384xf32, #tpu.memory_space<vmem>>, vector<4x384xf32>
    tpu.vector_store %arg7[%c8, %c0_11], %8 {strides = array<i32>} : memref<36x384xf32, #tpu.memory_space<vmem>>, vector<4x384xf32>,
    %c0_12 = arith.constant 0 : index
    %c0_13 = arith.constant 0 : index
    %c18 = arith.constant 18 : index
    %10 = vector.load %arg2[%c0_12, %c0_13, %c18] : memref<1x4x422xf32, #tpu.memory_space<vmem>>, vector<1x4x384xf32>
    %11 = vector.shape_cast %10 : vector<1x4x384xf32> to vector<4x384xf32>
    %c12 = arith.constant 12 : index
    %c0_14 = arith.constant 0 : index
    %12 = vector.load %arg7[%c12, %c0_14] : memref<36x384xf32, #tpu.memory_space<vmem>>, vector<4x384xf32>
    tpu.vector_store %arg7[%c12, %c0_14], %11 {strides = array<i32>} : memref<36x384xf32, #tpu.memory_space<vmem>>, vector<4x384xf32>,
    %c0_15 = arith.constant 0 : index
    %c0_16 = arith.constant 0 : index
    %c19 = arith.constant 19 : index
    %13 = vector.load %arg2[%c0_15, %c0_16, %c19] : memref<1x4x422xf32, #tpu.memory_space<vmem>>, vector<1x4x384xf32>
    %14 = vector.shape_cast %13 : vector<1x4x384xf32> to vector<4x384xf32>
    %c16 = arith.constant 16 : index
    %c0_17 = arith.constant 0 : index
    %15 = vector.load %arg7[%c16, %c0_17] : memref<36x384xf32, #tpu.memory_space<vmem>>, vector<4x384xf32>
    tpu.vector_store %arg7[%c16, %c0_17], %14 {strides = array<i32>} : memref<36x384xf32, #tpu.memory_space<vmem>>, vector<4x384xf32>,
    %c0_18 = arith.constant 0 : index
    %c0_19 = arith.constant 0 : index
    %c20 = arith.constant 20 : index
    %16 = vector.load %arg2[%c0_18, %c0_19, %c20] : memref<1x4x422xf32, #tpu.memory_space<vmem>>, vector<1x4x384xf32>
    %17 = vector.shape_cast %16 : vector<1x4x384xf32> to vector<4x384xf32>
    %c20_20 = arith.constant 20 : index
    %c0_21 = arith.constant 0 : index
    %18 = vector.load %arg7[%c20_20, %c0_21] : memref<36x384xf32, #tpu.memory_space<vmem>>, vector<4x384xf32>
    tpu.vector_store %arg7[%c20_20, %c0_21], %17 {strides = array<i32>} : memref<36x384xf32, #tpu.memory_space<vmem>>, vector<4x384xf32>,
    %c0_22 = arith.constant 0 : index
    %c0_23 = arith.constant 0 : index
    %c36 = arith.constant 36 : index
    %19 = vector.load %arg2[%c0_22, %c0_23, %c36] : memref<1x4x422xf32, #tpu.memory_space<vmem>>, vector<1x4x384xf32>
    %20 = vector.shape_cast %19 : vector<1x4x384xf32> to vector<4x384xf32>
    %c24 = arith.constant 24 : index
    %c0_24 = arith.constant 0 : index
    %21 = vector.load %arg7[%c24, %c0_24] : memref<36x384xf32, #tpu.memory_space<vmem>>, vector<4x384xf32>
    tpu.vector_store %arg7[%c24, %c0_24], %20 {strides = array<i32>} : memref<36x384xf32, #tpu.memory_space<vmem>>, vector<4x384xf32>,
    %c0_25 = arith.constant 0 : index
    %c0_26 = arith.constant 0 : index
    %c37 = arith.constant 37 : index
    %22 = vector.load %arg2[%c0_25, %c0_26, %c37] : memref<1x4x422xf32, #tpu.memory_space<vmem>>, vector<1x4x384xf32>
    %23 = vector.shape_cast %22 : vector<1x4x384xf32> to vector<4x384xf32>
    %c28 = arith.constant 28 : index
    %c0_27 = arith.constant 0 : index
    %24 = vector.load %arg7[%c28, %c0_27] : memref<36x384xf32, #tpu.memory_space<vmem>>, vector<4x384xf32>
    tpu.vector_store %arg7[%c28, %c0_27], %23 {strides = array<i32>} : memref<36x384xf32, #tpu.memory_space<vmem>>, vector<4x384xf32>,
    %c0_28 = arith.constant 0 : index
    %c0_29 = arith.constant 0 : index
    %c38 = arith.constant 38 : index
    %25 = vector.load %arg2[%c0_28, %c0_29, %c38] : memref<1x4x422xf32, #tpu.memory_space<vmem>>, vector<1x4x384xf32>
    %26 = vector.shape_cast %25 : vector<1x4x384xf32> to vector<4x384xf32>
    %c32 = arith.constant 32 : index
    %c0_30 = arith.constant 0 : index
    %27 = vector.load %arg7[%c32, %c0_30] : memref<36x384xf32, #tpu.memory_space<vmem>>, vector<4x384xf32>
    tpu.vector_store %arg7[%c32, %c0_30], %26 {strides = array<i32>} : memref<36x384xf32, #tpu.memory_space<vmem>>, vector<4x384xf32>,
    %c0_31 = arith.constant 0 : index
    %c0_32 = arith.constant 0 : index
    %28 = vector.load %arg3[%c0_31, %c0_32] : memref<4x36xf32, #tpu.memory_space<vmem>>, vector<4x36xf32>
    %c0_33 = arith.constant 0 : index
    %c0_34 = arith.constant 0 : index
    %29 = vector.load %arg7[%c0_33, %c0_34] : memref<36x384xf32, #tpu.memory_space<vmem>>, vector<36x384xf32>
    %cst = arith.constant dense<0.000000e+00> : vector<4x384xf32>
    %30 = tpu.matmul %28, %29, %cst {dimension_numbers = #tpu.dot_dimension_numbers<[1], [0], [0], [1], [0, 0, 1, 1], [], []>} : vector<4x36xf32>, vector<36x384xf32>, vector<4x384xf32> -> vector<4x384xf32>
    %c0_35 = arith.constant 0 : index
    %c0_36 = arith.constant 0 : index
    %31 = vector.load %arg5[%c0_35, %c0_36] : memref<4x4xf32, #tpu.memory_space<vmem>>, vector<4x1xf32>
    %c0_37 = arith.constant 0 : index
    %c1_38 = arith.constant 1 : index
    %32 = vector.load %arg5[%c0_37, %c1_38] : memref<4x4xf32, #tpu.memory_space<vmem>>, vector<4x1xf32>
    %33 = vector.broadcast %0 : vector<1x384xf32> to vector<4x384xf32>
    %34 = arith.mulf %30, %33 : vector<4x384xf32>
    %cst_39 = arith.constant dense<0.000000e+00> : vector<4xf32>
    %35 = vector.multi_reduction <add>, %34, %cst_39 [1] : vector<4x384xf32> to vector<4xf32>
    %36 = vector.shape_cast %35 : vector<4xf32> to vector<4x1xf32>
    %37 = arith.mulf %34, %34 : vector<4x384xf32>
    %cst_40 = arith.constant dense<0.000000e+00> : vector<4xf32>
    %38 = vector.multi_reduction <add>, %37, %cst_40 [1] : vector<4x384xf32> to vector<4xf32>
    %39 = vector.shape_cast %38 : vector<4xf32> to vector<4x1xf32>
    %cst_41 = arith.constant 3.906250e-03 : f32
    %40 = vector.broadcast %cst_41 : f32 to vector<4x1xf32>
    %41 = arith.mulf %36, %40 : vector<4x1xf32>
    %cst_42 = arith.constant 3.906250e-03 : f32
    %42 = vector.broadcast %cst_42 : f32 to vector<4x1xf32>
    %43 = arith.mulf %39, %42 : vector<4x1xf32>
    %44 = arith.mulf %41, %41 : vector<4x1xf32>
    %45 = arith.subf %43, %44 : vector<4x1xf32>
    %cst_43 = arith.constant 0.000000e+00 : f32
    %46 = vector.broadcast %cst_43 : f32 to vector<4x1xf32>
    %47 = arith.maximumf %45, %46 : vector<4x1xf32>
    %cst_44 = arith.constant 9.99999974E-6 : f32
    %48 = vector.broadcast %cst_44 : f32 to vector<4x1xf32>
    %49 = arith.addf %47, %48 : vector<4x1xf32>
    %50 = math.rsqrt %49 : vector<4x1xf32>
    %51 = arith.mulf %31, %50 : vector<4x1xf32>
    %52 = arith.mulf %41, %51 : vector<4x1xf32>
    %53 = arith.subf %32, %52 : vector<4x1xf32>
    %54 = vector.broadcast %51 : vector<4x1xf32> to vector<4x384xf32>
    %55 = arith.mulf %30, %54 : vector<4x384xf32>
    %56 = vector.broadcast %53 : vector<4x1xf32> to vector<4x384xf32>
    %57 = arith.addf %55, %56 : vector<4x384xf32>
    %cst_45 = arith.constant 0.000000e+00 : f32
    %58 = vector.broadcast %cst_45 : f32 to vector<4x384xf32>
    %59 = arith.maximumf %57, %58 : vector<4x384xf32>
    %cst_46 = arith.constant 0.000000e+00 : f32
    %60 = vector.broadcast %cst_46 : f32 to vector<4x8xf32>
    %c0_47 = arith.constant 0 : index
    %c0_48 = arith.constant 0 : index
    %61 = vector.load %arg8[%c0_47, %c0_48] : memref<4x400xf32, #tpu.memory_space<vmem>>, vector<4x8xf32>
    tpu.vector_store %arg8[%c0_47, %c0_48], %60 {strides = array<i32>} : memref<4x400xf32, #tpu.memory_space<vmem>>, vector<4x8xf32>,
    %c0_49 = arith.constant 0 : index
    %c8_50 = arith.constant 8 : index
    %62 = vector.load %arg8[%c0_49, %c8_50] : memref<4x400xf32, #tpu.memory_space<vmem>>, vector<4x384xf32>
    tpu.vector_store %arg8[%c0_49, %c8_50], %59 {strides = array<i32>} : memref<4x400xf32, #tpu.memory_space<vmem>>, vector<4x384xf32>,
    %c0_51 = arith.constant 0 : index
    %c392 = arith.constant 392 : index
    %63 = vector.load %arg8[%c0_51, %c392] : memref<4x400xf32, #tpu.memory_space<vmem>>, vector<4x8xf32>
    tpu.vector_store %arg8[%c0_51, %c392], %60 {strides = array<i32>} : memref<4x400xf32, #tpu.memory_space<vmem>>, vector<4x8xf32>,
    %c0_52 = arith.constant 0 : index
    %c7 = arith.constant 7 : index
    %64 = vector.load %arg8[%c0_52, %c7] : memref<4x400xf32, #tpu.memory_space<vmem>>, vector<4x288xf32>
    %c0_53 = arith.constant 0 : index
    %c9 = arith.constant 9 : index
    %65 = vector.load %arg8[%c0_53, %c9] : memref<4x400xf32, #tpu.memory_space<vmem>>, vector<4x288xf32>
    %c0_54 = arith.constant 0 : index
    %c5 = arith.constant 5 : index
    %66 = vector.load %arg8[%c0_54, %c5] : memref<4x400xf32, #tpu.memory_space<vmem>>, vector<4x288xf32>
    %c1_55 = arith.constant 1 : index
    %c0_56 = arith.constant 0 : index
    %67 = vector.load %arg1[%c1_55, %c0_56] : memref<4x384xf32, #tpu.memory_space<vmem>>, vector<1x288xf32>
    %68 = vector.broadcast %67 : vector<1x288xf32> to vector<4x288xf32>
    %69 = arith.mulf %64, %68 : vector<4x288xf32>
    %c2_57 = arith.constant 2 : index
    %c0_58 = arith.constant 0 : index
    %70 = vector.load %arg1[%c2_57, %c0_58] : memref<4x384xf32, #tpu.memory_space<vmem>>, vector<1x288xf32>
    %71 = vector.broadcast %70 : vector<1x288xf32> to vector<4x288xf32>
    %72 = arith.mulf %65, %71 : vector<4x288xf32>
    %73 = arith.addf %69, %72 : vector<4x288xf32>
    %c3 = arith.constant 3 : index
    %c0_59 = arith.constant 0 : index
    %74 = vector.load %arg1[%c3, %c0_59] : memref<4x384xf32, #tpu.memory_space<vmem>>, vector<1x288xf32>
    %75 = vector.broadcast %74 : vector<1x288xf32> to vector<4x288xf32>
    %76 = arith.mulf %66, %75 : vector<4x288xf32>
    %77 = arith.addf %73, %76 : vector<4x288xf32>
    %78 = vector.extract_strided_slice %77 {offsets = [0, 18], sizes = [4, 18], strides = [1, 1]} : vector<4x288xf32> to vector<4x18xf32>
    %c0_60 = arith.constant 0 : index
    %c0_61 = arith.constant 0 : index
    %79 = vector.load %arg9[%c0_60, %c0_61] : memref<4x422xf32, #tpu.memory_space<vmem>>, vector<4x18xf32>
    tpu.vector_store %arg9[%c0_60, %c0_61], %78 {strides = array<i32>} : memref<4x422xf32, #tpu.memory_space<vmem>>, vector<4x18xf32>,
    %c0_62 = arith.constant 0 : index
    %c18_63 = arith.constant 18 : index
    %80 = vector.load %arg9[%c0_62, %c18_63] : memref<4x422xf32, #tpu.memory_space<vmem>>, vector<4x288xf32>
    tpu.vector_store %arg9[%c0_62, %c18_63], %77 {strides = array<i32>} : memref<4x422xf32, #tpu.memory_space<vmem>>, vector<4x288xf32>,
    %81 = vector.extract_strided_slice %77 {offsets = [0, 252], sizes = [4, 18], strides = [1, 1]} : vector<4x288xf32> to vector<4x18xf32>
    %c0_64 = arith.constant 0 : index
    %c306 = arith.constant 306 : index
    %82 = vector.load %arg9[%c0_64, %c306] : memref<4x422xf32, #tpu.memory_space<vmem>>, vector<4x18xf32>
    tpu.vector_store %arg9[%c0_64, %c306], %81 {strides = array<i32>} : memref<4x422xf32, #tpu.memory_space<vmem>>, vector<4x18xf32>,
    %cst_65 = arith.constant 0.000000e+00 : f32
    %83 = vector.broadcast %cst_65 : f32 to vector<4x98xf32>
    %c0_66 = arith.constant 0 : index
    %c324 = arith.constant 324 : index
    %84 = vector.load %arg9[%c0_66, %c324] : memref<4x422xf32, #tpu.memory_space<vmem>>, vector<4x98xf32>
    tpu.vector_store %arg9[%c0_66, %c324], %83 {strides = array<i32>} : memref<4x422xf32, #tpu.memory_space<vmem>>, vector<4x98xf32>,
    %c0_67 = arith.constant 0 : index
    %c0_68 = arith.constant 0 : index
    %85 = vector.load %arg9[%c0_67, %c0_68] : memref<4x422xf32, #tpu.memory_space<vmem>>, vector<4x384xf32>
    %c0_69 = arith.constant 0 : index
    %c0_70 = arith.constant 0 : index
    %86 = vector.load %arg7[%c0_69, %c0_70] : memref<36x384xf32, #tpu.memory_space<vmem>>, vector<4x384xf32>
    tpu.vector_store %arg7[%c0_69, %c0_70], %85 {strides = array<i32>} : memref<36x384xf32, #tpu.memory_space<vmem>>, vector<4x384xf32>,
    %c0_71 = arith.constant 0 : index
    %c1_72 = arith.constant 1 : index
    %87 = vector.load %arg9[%c0_71, %c1_72] : memref<4x422xf32, #tpu.memory_space<vmem>>, vector<4x384xf32>
    %c4_73 = arith.constant 4 : index
    %c0_74 = arith.constant 0 : index
    %88 = vector.load %arg7[%c4_73, %c0_74] : memref<36x384xf32, #tpu.memory_space<vmem>>, vector<4x384xf32>
    tpu.vector_store %arg7[%c4_73, %c0_74], %87 {strides = array<i32>} : memref<36x384xf32, #tpu.memory_space<vmem>>, vector<4x384xf32>,
    %c0_75 = arith.constant 0 : index
    %c2_76 = arith.constant 2 : index
    %89 = vector.load %arg9[%c0_75, %c2_76] : memref<4x422xf32, #tpu.memory_space<vmem>>, vector<4x384xf32>
    %c8_77 = arith.constant 8 : index
    %c0_78 = arith.constant 0 : index
    %90 = vector.load %arg7[%c8_77, %c0_78] : memref<36x384xf32, #tpu.memory_space<vmem>>, vector<4x384xf32>
    tpu.vector_store %arg7[%c8_77, %c0_78], %89 {strides = array<i32>} : memref<36x384xf32, #tpu.memory_space<vmem>>, vector<4x384xf32>,
    %c0_79 = arith.constant 0 : index
    %c18_80 = arith.constant 18 : index
    %91 = vector.load %arg9[%c0_79, %c18_80] : memref<4x422xf32, #tpu.memory_space<vmem>>, vector<4x384xf32>
    %c12_81 = arith.constant 12 : index
    %c0_82 = arith.constant 0 : index
    %92 = vector.load %arg7[%c12_81, %c0_82] : memref<36x384xf32, #tpu.memory_space<vmem>>, vector<4x384xf32>
    tpu.vector_store %arg7[%c12_81, %c0_82], %91 {strides = array<i32>} : memref<36x384xf32, #tpu.memory_space<vmem>>, vector<4x384xf32>,
    %c0_83 = arith.constant 0 : index
    %c19_84 = arith.constant 19 : index
    %93 = vector.load %arg9[%c0_83, %c19_84] : memref<4x422xf32, #tpu.memory_space<vmem>>, vector<4x384xf32>
    %c16_85 = arith.constant 16 : index
    %c0_86 = arith.constant 0 : index
    %94 = vector.load %arg7[%c16_85, %c0_86] : memref<36x384xf32, #tpu.memory_space<vmem>>, vector<4x384xf32>
    tpu.vector_store %arg7[%c16_85, %c0_86], %93 {strides = array<i32>} : memref<36x384xf32, #tpu.memory_space<vmem>>, vector<4x384xf32>,
    %c0_87 = arith.constant 0 : index
    %c20_88 = arith.constant 20 : index
    %95 = vector.load %arg9[%c0_87, %c20_88] : memref<4x422xf32, #tpu.memory_space<vmem>>, vector<4x384xf32>
    %c20_89 = arith.constant 20 : index
    %c0_90 = arith.constant 0 : index
    %96 = vector.load %arg7[%c20_89, %c0_90] : memref<36x384xf32, #tpu.memory_space<vmem>>, vector<4x384xf32>
    tpu.vector_store %arg7[%c20_89, %c0_90], %95 {strides = array<i32>} : memref<36x384xf32, #tpu.memory_space<vmem>>, vector<4x384xf32>,
    %c0_91 = arith.constant 0 : index
    %c36_92 = arith.constant 36 : index
    %97 = vector.load %arg9[%c0_91, %c36_92] : memref<4x422xf32, #tpu.memory_space<vmem>>, vector<4x384xf32>
    %c24_93 = arith.constant 24 : index
    %c0_94 = arith.constant 0 : index
    %98 = vector.load %arg7[%c24_93, %c0_94] : memref<36x384xf32, #tpu.memory_space<vmem>>, vector<4x384xf32>
    tpu.vector_store %arg7[%c24_93, %c0_94], %97 {strides = array<i32>} : memref<36x384xf32, #tpu.memory_space<vmem>>, vector<4x384xf32>,
    %c0_95 = arith.constant 0 : index
    %c37_96 = arith.constant 37 : index
    %99 = vector.load %arg9[%c0_95, %c37_96] : memref<4x422xf32, #tpu.memory_space<vmem>>, vector<4x384xf32>
    %c28_97 = arith.constant 28 : index
    %c0_98 = arith.constant 0 : index
    %100 = vector.load %arg7[%c28_97, %c0_98] : memref<36x384xf32, #tpu.memory_space<vmem>>, vector<4x384xf32>
    tpu.vector_store %arg7[%c28_97, %c0_98], %99 {strides = array<i32>} : memref<36x384xf32, #tpu.memory_space<vmem>>, vector<4x384xf32>,
    %c0_99 = arith.constant 0 : index
    %c38_100 = arith.constant 38 : index
    %101 = vector.load %arg9[%c0_99, %c38_100] : memref<4x422xf32, #tpu.memory_space<vmem>>, vector<4x384xf32>
    %c32_101 = arith.constant 32 : index
    %c0_102 = arith.constant 0 : index
    %102 = vector.load %arg7[%c32_101, %c0_102] : memref<36x384xf32, #tpu.memory_space<vmem>>, vector<4x384xf32>
    tpu.vector_store %arg7[%c32_101, %c0_102], %101 {strides = array<i32>} : memref<36x384xf32, #tpu.memory_space<vmem>>, vector<4x384xf32>,
    %c0_103 = arith.constant 0 : index
    %c0_104 = arith.constant 0 : index
    %103 = vector.load %arg4[%c0_103, %c0_104] : memref<4x36xf32, #tpu.memory_space<vmem>>, vector<4x36xf32>
    %c0_105 = arith.constant 0 : index
    %c0_106 = arith.constant 0 : index
    %104 = vector.load %arg7[%c0_105, %c0_106] : memref<36x384xf32, #tpu.memory_space<vmem>>, vector<36x384xf32>
    %cst_107 = arith.constant dense<0.000000e+00> : vector<4x384xf32>
    %105 = tpu.matmul %103, %104, %cst_107 {dimension_numbers = #tpu.dot_dimension_numbers<[1], [0], [0], [1], [0, 0, 1, 1], [], []>} : vector<4x36xf32>, vector<36x384xf32>, vector<4x384xf32> -> vector<4x384xf32>
    %c0_108 = arith.constant 0 : index
    %c2_109 = arith.constant 2 : index
    %106 = vector.load %arg5[%c0_108, %c2_109] : memref<4x4xf32, #tpu.memory_space<vmem>>, vector<4x1xf32>
    %c0_110 = arith.constant 0 : index
    %c3_111 = arith.constant 3 : index
    %107 = vector.load %arg5[%c0_110, %c3_111] : memref<4x4xf32, #tpu.memory_space<vmem>>, vector<4x1xf32>
    %108 = vector.broadcast %0 : vector<1x384xf32> to vector<4x384xf32>
    %109 = arith.mulf %105, %108 : vector<4x384xf32>
    %cst_112 = arith.constant dense<0.000000e+00> : vector<4xf32>
    %110 = vector.multi_reduction <add>, %109, %cst_112 [1] : vector<4x384xf32> to vector<4xf32>
    %111 = vector.shape_cast %110 : vector<4xf32> to vector<4x1xf32>
    %112 = arith.mulf %109, %109 : vector<4x384xf32>
    %cst_113 = arith.constant dense<0.000000e+00> : vector<4xf32>
    %113 = vector.multi_reduction <add>, %112, %cst_113 [1] : vector<4x384xf32> to vector<4xf32>
    %114 = vector.shape_cast %113 : vector<4xf32> to vector<4x1xf32>
    %cst_114 = arith.constant 3.906250e-03 : f32
    %115 = vector.broadcast %cst_114 : f32 to vector<4x1xf32>
    %116 = arith.mulf %111, %115 : vector<4x1xf32>
    %cst_115 = arith.constant 3.906250e-03 : f32
    %117 = vector.broadcast %cst_115 : f32 to vector<4x1xf32>
    %118 = arith.mulf %114, %117 : vector<4x1xf32>
    %119 = arith.mulf %116, %116 : vector<4x1xf32>
    %120 = arith.subf %118, %119 : vector<4x1xf32>
    %cst_116 = arith.constant 0.000000e+00 : f32
    %121 = vector.broadcast %cst_116 : f32 to vector<4x1xf32>
    %122 = arith.maximumf %120, %121 : vector<4x1xf32>
    %cst_117 = arith.constant 9.99999974E-6 : f32
    %123 = vector.broadcast %cst_117 : f32 to vector<4x1xf32>
    %124 = arith.addf %122, %123 : vector<4x1xf32>
    %125 = math.rsqrt %124 : vector<4x1xf32>
    %126 = arith.mulf %106, %125 : vector<4x1xf32>
    %127 = arith.mulf %116, %126 : vector<4x1xf32>
    %128 = arith.subf %107, %127 : vector<4x1xf32>
    %129 = vector.broadcast %126 : vector<4x1xf32> to vector<4x384xf32>
    %130 = arith.mulf %105, %129 : vector<4x384xf32>
    %131 = vector.broadcast %128 : vector<4x1xf32> to vector<4x384xf32>
    %132 = arith.addf %130, %131 : vector<4x384xf32>
    %c0_118 = arith.constant 0 : index
    %c0_119 = arith.constant 0 : index
    %c19_120 = arith.constant 19 : index
    %133 = vector.load %arg2[%c0_118, %c0_119, %c19_120] : memref<1x4x422xf32, #tpu.memory_space<vmem>>, vector<1x4x384xf32>
    %134 = vector.shape_cast %133 : vector<1x4x384xf32> to vector<4x384xf32>
    %135 = arith.addf %132, %134 : vector<4x384xf32>
    %c0_121 = arith.constant 0 : index
    %c0_122 = arith.constant 0 : index
    %c0_123 = arith.constant 0 : index
    %136 = vector.load %arg6[%c0_121, %c0_122, %c0_123] : memref<1x4x384xf32, #tpu.memory_space<vmem>>, vector<1x4x384xf32>
    %137 = vector.shape_cast %136 : vector<1x4x384xf32> to vector<4x384xf32>
    %138 = vector.shape_cast %135 : vector<4x384xf32> to vector<1x4x384xf32>
    tpu.vector_store %arg6[%c0_121, %c0_122, %c0_123], %138 {strides = array<i32>} : memref<1x4x384xf32, #tpu.memory_space<vmem>>, vector<1x4x384xf32>,
    return
  }
  func.func @transform_0(%arg0: i32) -> (i32, i32) {
    %c0_i32 = arith.constant 0 : i32
    %c0_i32_0 = arith.constant 0 : i32
    %c0_i32_1 = arith.constant 0 : i32
    return %c0_i32, %c0_i32_0 : i32, i32
  }
  func.func @transform_1(%arg0: i32) -> (i32, i32, i32) {
    %c0_i32 = arith.constant 0 : i32
    %c0_i32_0 = arith.constant 0 : i32
    %c0_i32_1 = arith.constant 0 : i32
    return %arg0, %c0_i32, %c0_i32_0 : i32, i32, i32
  }
  func.func @transform_2(%arg0: i32) -> (i32, i32) {
    %c0_i32 = arith.constant 0 : i32
    %c0_i32_0 = arith.constant 0 : i32
    %c0_i32_1 = arith.constant 0 : i32
    return %c0_i32, %c0_i32_0 : i32, i32
  }
  func.func @transform_3(%arg0: i32) -> (i32, i32) {
    %c0_i32 = arith.constant 0 : i32
    %c0_i32_0 = arith.constant 0 : i32
    %c0_i32_1 = arith.constant 0 : i32
    return %c0_i32, %c0_i32_0 : i32, i32
  }
  func.func @transform_4(%arg0: i32) -> (i32, i32) {
    %c0_i32 = arith.constant 0 : i32
    %c0_i32_0 = arith.constant 0 : i32
    %c0_i32_1 = arith.constant 0 : i32
    return %c0_i32, %c0_i32_0 : i32, i32
  }
  func.func @transform_5(%arg0: i32) -> (i32, i32, i32) {
    %c0_i32 = arith.constant 0 : i32
    %c0_i32_0 = arith.constant 0 : i32
    %c0_i32_1 = arith.constant 0 : i32
    return %arg0, %c0_i32, %c0_i32_0 : i32, i32, i32
  }
}

</mosaic_0001>

<bundles_post_ra>
// kernel: _residual_block_forward.1
= control target key start
LH: loop header
LB: loop body
LE: loop exit
PB: predicated region body
PF: predicated region fallthrough
CT: control target
= control target key end

     0   :  { %s1538_s18 = smov 0   ;;  %s1814_s0 = inlined_call_operand.vmem [shape: f32[4,384], index: 0, kind: input, shape index: {}]   ;;  %s1815_s1 = inlined_call_operand.vmem [shape: f32[2,4,422], index: 1, kind: input, shape index: {}]   ;;  %s1816_s2 = inlined_call_operand.vmem [shape: f32[4,36], index: 2, kind: input, shape index: {}]   ;;  %s1817_s3 = inlined_call_operand.vmem [shape: f32[4,36], index: 3, kind: input, shape index: {}]   ;;  %s1818_s4 = inlined_call_operand.vmem [shape: f32[4,4], index: 4, kind: input, shape index: {}]   ;;  %s1819_s5 = inlined_call_operand.vmem [shape: f32[2,4,384], index: 5, kind: output, shape index: {}]  }
   0x1 LB: > { %s1335_s19 = sadd.s32 4294967295, %s1482_s18   ;;  %p1339_p0 = scmp.ge.s32.totalorder %s1482_s18, 1  ;;  %s1482_s18 = sphi %s1538_s18, %s15_s18  }
   0x2   : > { %p187_p1 = scmp.lt.s32.totalorder %s1482_s18, 3 }
   0x4   : > { %p188_p2 = pnand %p1339_p0, %p187_p1 }
   0x5   : > { %p215_p3 = scmp.lt.s32.totalorder (!%p188_p2), %s1335_s19, 1  ;;  %s1484_s24 = smov (!%p188_p2), 126   ;;  %v1487_v7 = vmov (!%p188_p2), 0.0|0.0   ;;  %v1492_v8 = vmov (!%p188_p2), 0.0   ;;  %vm1494_vm0 = vmmov (!%p188_p2), 0   ;;  %vm272_vm1 = vcmask (!%p188_p2), 1031168  }
   0x6   : > { %191 = sbr.rel (%p188_p2) target bundleno = 2054 (0x806), region = 40  ;;  %s1485_s25 = smov (!%p188_p2), 127   ;;  %1405 = vmatprep.subr.bf16.mxu1 (!%p188_p2), %v1487_v7  ;;  %520 = vmatprep.mubr.f32.mxu0 (!%p188_p2), %v1492_v8  ;;  %vm296_vm2 = vcmask (!%p188_p2), 900096   ;;  %vm248_vm3 = vcmask (!%p188_p2), 1039360   ;;  %vm320_vm4 = vcmask (!%p188_p2), 891904   ;;  %vm344_vm5 = vcmask (!%p188_p2), 883712  }
   0x7   : > { %s1486_s26 = smov (!%p188_p2), 110   ;;  %s1488_s27 = smov (!%p188_p2), 109   ;;  %1381 = vmatprep.mubr.msk.f32.mxu1 (!%p188_p2), %vm1494_vm0, %v1492_v8  ;;  %vm1823_vm6 = vcmask (!%p188_p2), 752640   ;;  %vm392_vm7 = vcmask (!%p188_p2), 744448   ;;  %vm1822_vm8 = vcmask (!%p188_p2), 736256   ;;  %vm1821_vm9 = vcmask (!%p188_p2), 1043456  }
   0x8   : > { %s1489_s28 = smov (!%p188_p2), 108   ;;  %s1490_s29 = smov (!%p188_p2), 92   ;;  %vm1820_vm10 = vcmask (!%p188_p2), 293888   ;;  %vm667_vm11 = vcmask (!%p188_p2), 60416   ;;  %vm685_vm12 = vcmask (!%p188_p2), 1043520   ;;  %vm686_vm13 = vcmask (!%p188_p2), 1047556  }
   0x9   : > { %s1491_s30 = smov (!%p188_p2), 91   ;;  %s1493_s6 = smov (!%p188_p2), 90   ;;  %668 = vst.msk [vmem:[#allocation3] sm:$0xf] (!%p188_p2), %vm667_vm11, %v1492_v8  ;;  %vm679_vm14 = vcmask (!%p188_p2), 64512   ;;  %vm687_vm15 = vmor (!%p188_p2), %vm686_vm13, %vm685_vm12  ;;  %vm745_vm11 = vcmask (!%p188_p2), 72704  }
   0xa   : > { %s1497_s13 = smov (!%p188_p2), 1   ;;  %s1499_s7 = smov (!%p188_p2), 5   ;;  %vm787_vm12 = vcmask (!%p188_p2), 39936  }
   0xb   : > { %s1500_s8 = smov (!%p188_p2), 7   ;;  %s1501_s9 = smov (!%p188_p2), 8  }
   0xc   : > { %s1502_s10 = smov (!%p188_p2), 2   ;;  %s1503_s11 = smov (!%p188_p2), 11  }
   0xd   : > { %s1842_s19 = smov (!%p215_p3, %s1335_s19), 1  ;;  %s1504_s12 = smov 47  }
   0xe   : > { %s1358_s20 = sshll.u32 %s1842_s19, 4  ;;  %s1505_s14 = smov 103  }
   0xf   : > { %s1552_s23 = scalar_lea.vmem %s1815_s1, %s1358_s20  ;;  %s1498_s20 = smov 9  }
  0x10   : > { %v259_v0 = vld [vmem:[%s1552_s23 + $0x8] sm:$0xff]  ;;  %v234_v1 = vld [vmem:[%s1552_s23] sm:$0xff] }
  0x11   : > { %268 = vrot.lane.b32.xlu1 %v259_v0, %s1484_s24  ;;  %242 = vrot.lane.b32.xlu0 %v234_v1, %s1485_s25  ;;  %v262_v2 = vcombine.high %v234_v1, %v234_v1  ;;  %231 = vst [vmem:[#allocation2] sm:$0xf] %v234_v1  ;;  %v227_v3 = vld [vmem:[%s1552_s23 + $0x8] sm:$0xf]  ;;  %v287_v4 = vcombine.low %v259_v0, %v259_v0 }
  0x12   : > { %233 = vst [vmem:[#allocation2 + $0x10] sm:$0xf] %v227_v3  ;;  %v238_v5 = vcombine.low %v234_v1, %v234_v1  ;;  %v263_v6 = vcombine.high %v259_v0, %v259_v0 }
  0x13   : > { %232 = vst [vmem:[#allocation2 + $0x8] sm:$0xf] %v262_v2 }
  0x15   : > { %266 = vrot.lane.b32.xlu1 %v262_v2, %s1484_s24  ;;  %290 = vrot.lane.b32.xlu0 %v234_v1, %s1486_s26 }
  0x19   : > { %292 = vrot.lane.b32.xlu1 %v287_v4, %s1486_s26  ;;  %244 = vrot.lane.b32.xlu0 %v287_v4, %s1485_s25 }
  0x1d   : > { %264 = vrot.lane.b32.xlu1 %v234_v1, %s1484_s24  ;;  %240 = vrot.lane.b32.xlu0 %v238_v5, %s1485_s25 }
  0x21   : > { %246 = vrot.lane.b32.xlu1 %v259_v0, %s1485_s25  ;;  %288 = vrot.lane.b32.xlu0 %v238_v5, %s1486_s26 }
  0x25   : > { %294 = vrot.lane.b32.xlu1 %v259_v0, %s1486_s26  ;;  %270 = vrot.lane.b32.xlu0 %v263_v6, %s1484_s24 }
  0x29   : > { %316 = vrot.lane.b32.xlu1 %v259_v0, %s1488_s27  ;;  %314 = vrot.lane.b32.xlu0 %v262_v2, %s1488_s27 }
  0x2d   : > { %340 = vrot.lane.b32.xlu1 %v287_v4, %s1489_s28  ;;  %338 = vrot.lane.b32.xlu0 %v234_v1, %s1489_s28 }
  0x31   : > { %364 = vrot.lane.b32.xlu1 %v259_v0, %s1490_s29  ;;  %362 = vrot.lane.b32.xlu0 %v262_v2, %s1490_s29 }
  0x35   : > { %388 = vrot.lane.b32.xlu1 %v287_v4, %s1491_s30  ;;  %386 = vrot.lane.b32.xlu0 %v234_v1, %s1491_s30 }
  0x39   : > { %336 = vrot.lane.b32.xlu1 %v238_v5, %s1489_s28  ;;  %312 = vrot.lane.b32.xlu0 %v234_v1, %s1488_s27 }
  0x3d   : > { %384 = vrot.lane.b32.xlu1 %v238_v5, %s1491_s30  ;;  %360 = vrot.lane.b32.xlu0 %v234_v1, %s1490_s29 }
  0x41   : > { %342 = vrot.lane.b32.xlu1 %v259_v0, %s1489_s28  ;;  %318 = vrot.lane.b32.xlu0 %v263_v6, %s1488_s27 }
  0x45   : > { %390 = vrot.lane.b32.xlu1 %v259_v0, %s1491_s30  ;;  %366 = vrot.lane.b32.xlu0 %v263_v6, %s1490_s29 }
  0x49   : > { %412 = vrot.lane.b32.xlu1 %v259_v0, %s1493_s6  ;;  %410 = vrot.lane.b32.xlu0 %v262_v2, %s1493_s6 }
  0x4d   : > { %414 = vrot.lane.b32.xlu1 %v263_v6, %s1493_s6  ;;  %408 = vrot.lane.b32.xlu0 %v234_v1, %s1493_s6 }
  0x83   : > { %v269_v9 = vpop.permute.xlu1 %268  ;;  %v243_v10 = vpop.permute.xlu0 %242 }
  0x87   : > { %v267_v11 = vpop.permute.xlu1 %266  ;;  %v291_v12 = vpop.permute.xlu0 %290 }
  0x88   : > { %v274_v13 = vsel %vm272_vm1, %v267_v11, %v269_v9 }
  0x89   : > { %280 = vst [vmem:[#allocation2 + $0x20] sm:$0xf] %v274_v13 }
  0x8b   : > { %v293_v14 = vpop.permute.xlu1 %292  ;;  %v245_v15 = vpop.permute.xlu0 %244 }
  0x8c   : > { %v298_v16 = vsel %vm296_vm2, %v291_v12, %v293_v14  ;;  %v250_v17 = vsel %vm248_vm3, %v243_v10, %v245_v15 }
  0x8d   : > { %304 = vst [vmem:[#allocation2 + $0x20] sm:$0xf0] %v298_v16  ;;  %256 = vst [vmem:[#allocation2 + $0x8] sm:$0xf0] %v250_v17 }
  0x8f   : > { %v265_v18 = vpop.permute.xlu1 %264  ;;  %v241_v19 = vpop.permute.xlu0 %240 }
  0x90   : > { %v273_v20 = vsel %vm272_vm1, %v265_v18, %v267_v11  ;;  %v249_v21 = vsel %vm248_vm3, %v241_v19, %v243_v10 }
  0x91   : > { %279 = vst [vmem:[#allocation2 + $0x18] sm:$0xf] %v273_v20  ;;  %255 = vst [vmem:[#allocation2] sm:$0xf0] %v249_v21 }
  0x93   : > { %v247_v22 = vpop.permute.xlu1 %246  ;;  %v289_v23 = vpop.permute.xlu0 %288 }
  0x94   : > { %v251_v24 = vsel %vm248_vm3, %v245_v15, %v247_v22  ;;  %v297_v25 = vsel %vm296_vm2, %v289_v23, %v291_v12  ;;  %v428_v26 = vld [vmem:[#allocation2 + $0x8] sm:$0xff]  ;;  %v431_v27 = vld [vmem:[#allocation2 + $0x20] sm:$0xff] }
  0x95   : > { %257 = vst [vmem:[#allocation2 + $0x10] sm:$0xf0] %v251_v24  ;;  %303 = vst [vmem:[#allocation2 + $0x18] sm:$0xf0] %v297_v25  ;;  %v1397_v28 = vpack.c.bf16 %v431_v27, %v428_v26  ;;  %v426_v22 = vld [vmem:[%s1816_s2] sm:$0xf]  ;;  %v599_v25 = vlaneseq }
  0x97   : > { %v295_v29 = vpop.permute.xlu1 %294  ;;  %v271_v30 = vpop.permute.xlu0 %270  ;;  %1398 = vmatprep.subr.bf16.mxu0 %v1397_v28  ;;  %v600_v26 = vshrl.u32 %v599_v25, 7 }
  0x98   : > { %v299_v31 = vsel %vm296_vm2, %v293_v14, %v295_v29  ;;  %v275_v32 = vsel %vm272_vm1, %v269_v9, %v271_v30  ;;  %v427_v36 = vld [vmem:[#allocation2] sm:$0xff] }
  0x99   : > { %305 = vst [vmem:[#allocation2 + $0x28] sm:$0xf0] %v299_v31  ;;  %281 = vst [vmem:[#allocation2 + $0x28] sm:$0xf] %v275_v32  ;;  %v1631_v27 = vsub.s32 0, %v600_v26  ;;  %v1633_v28 = vsub.s32 2, %v600_v26 }
  0x9a   : > { %v225_v29 = vld [vmem:[%s1814_s0] ss:$4 sm:$0x7]  ;;  %v1638_v30 = vsub.s32 1, %v600_v26 }
  0x9b   : > { %v317_v33 = vpop.permute.xlu1 %316  ;;  %v315_v34 = vpop.permute.xlu0 %314  ;;  %v1641_v31 = vrot.slane %v225_v29, %v1631_v27  ;;  %v1644_v32 = vrot.slane %v225_v29, %v1633_v28 }
  0x9c   : > { %v322_v35 = vsel %vm320_vm4, %v315_v34, %v317_v33  ;;  %v430_v37 = vld [vmem:[#allocation2 + $0x18] sm:$0xff]  ;;  %v429_v42 = vld [vmem:[#allocation2 + $0x10] sm:$0xff] }
  0x9d   : > { %328 = vst [vmem:[#allocation2 + $0x38] sm:$0xf] %v322_v35  ;;  %v1399_v38 = vpack.c.bf16 %v430_v37, %v427_v36 }
  0x9f   : > { %v341_v39 = vpop.permute.xlu1 %340  ;;  %v339_v40 = vpop.permute.xlu0 %338  ;;  %1400 = vmatpush1.bf16.msra.mxu0 %v1399_v38 }
  0xa0   : > { %v346_v41 = vsel %vm344_vm5, %v339_v40, %v341_v39  ;;  %v432_v43 = vld [vmem:[#allocation2 + $0x28] sm:$0xff] }
  0xa1   : > { %352 = vst [vmem:[#allocation2 + $0x38] sm:$0xf0] %v346_v41  ;;  %v1406_v44 = vpack.c.bf16 %v432_v43, %v429_v42 }
  0xa3   : > { %v365_v45 = vpop.permute.xlu1 %364  ;;  %v363_v46 = vpop.permute.xlu0 %362  ;;  %1407 = vmatpush3.bf16.msra.mxu1 %v1406_v44 }
  0xa4   : > { %v370_v47 = vsel %vm1823_vm6, %v363_v46, %v365_v45  ;;  %1408 = vmatprep.subr.bf16.mxu1 %v1487_v7 }
  0xa5   : > { %376 = vst [vmem:[#allocation2 + $0x50] sm:$0xf] %v370_v47 }
  0xa7   : > { %v389_v48 = vpop.permute.xlu1 %388  ;;  %v387_v49 = vpop.permute.xlu0 %386 }
  0xa8   : > { %v394_v50 = vsel %vm392_vm7, %v387_v49, %v389_v48  ;;  %v434_v59 = vld [vmem:[#allocation2 + $0x38] sm:$0xff] }
  0xa9   : > { %400 = vst [vmem:[#allocation2 + $0x50] sm:$0xf0] %v394_v50 }
  0xab   : > { %v337_v51 = vpop.permute.xlu1 %336  ;;  %v313_v52 = vpop.permute.xlu0 %312 }
  0xac   : > { %v345_v53 = vsel %vm344_vm5, %v337_v51, %v339_v40  ;;  %v321_v54 = vsel %vm320_vm4, %v313_v52, %v315_v34 }
  0xad   : > { %351 = vst [vmem:[#allocation2 + $0x30] sm:$0xf0] %v345_v53  ;;  %327 = vst [vmem:[#allocation2 + $0x30] sm:$0xf] %v321_v54  ;;  %v1495_v54 = vmov 0  }
  0xae   : > { %1458 = vset.pattern.permute.xlu1 %v1495_v54 }
  0xaf   : > { %v385_v55 = vpop.permute.xlu1 %384  ;;  %v361_v56 = vpop.permute.xlu0 %360 }
  0xb0   : > { %v393_v57 = vsel %vm392_vm7, %v385_v55, %v387_v49  ;;  %v369_v58 = vsel %vm1823_vm6, %v361_v56, %v363_v46  ;;  %v437_v60 = vld [vmem:[#allocation2 + $0x50] sm:$0xff] }
  0xb1   : > { %399 = vst [vmem:[#allocation2 + $0x48] sm:$0xf0] %v393_v57  ;;  %375 = vst [vmem:[#allocation2 + $0x48] sm:$0xf] %v369_v58  ;;  %v1401_v61 = vpack.c.bf16 %v437_v60, %v434_v59 }
  0xb3   : > { %v343_v62 = vpop.permute.xlu1 %342  ;;  %v319_v63 = vpop.permute.xlu0 %318  ;;  %1402 = vmatprep.subr.bf16.mxu0 %v1401_v61 }
  0xb4   : > { %v347_v0 = vsel %vm344_vm5, %v341_v39, %v343_v62  ;;  %v323_v1 = vsel %vm320_vm4, %v317_v33, %v319_v63  ;;  %v433_v6 = vld [vmem:[#allocation2 + $0x30] sm:$0xff]  ;;  %v1647_v33 = vrot.slane %v225_v29, %v1638_v30  ;;  %v1496_v63 = vmov 1  }
  0xb5   : > { %353 = vst [vmem:[#allocation2 + $0x40] sm:$0xf0] %v347_v0  ;;  %329 = vst [vmem:[#allocation2 + $0x40] sm:$0xf] %v323_v1  ;;  %1459 = vset.pattern.permute.xlu0 %v1496_v63  ;;  %v597_v0 = vld [vmem:[%s1818_s4] sm:$0xf] }
  0xb7   : > { %v391_v2 = vpop.permute.xlu1 %390  ;;  %v367_v3 = vpop.permute.xlu0 %366 }
  0xb8   : > { %v395_v4 = vsel %vm392_vm7, %v389_v48, %v391_v2  ;;  %v371_v5 = vsel %vm1823_vm6, %v365_v45, %v367_v3  ;;  %v436_v9 = vld [vmem:[#allocation2 + $0x48] sm:$0xff] }
  0xb9   : > { %401 = vst [vmem:[#allocation2 + $0x58] sm:$0xf0] %v395_v4  ;;  %377 = vst [vmem:[#allocation2 + $0x58] sm:$0xf] %v371_v5  ;;  %v1403_v10 = vpack.c.bf16 %v436_v9, %v433_v6 }
  0xba   : > { %v1349_v6 = vld [vmem:[%s1814_s0 + $0x2] ss:$4 sm:$0x7] }
  0xbb   : > { %v413_v11 = vpop.permute.xlu1 %412  ;;  %v411_v12 = vpop.permute.xlu0 %410  ;;  %1404 = vmatpush1.bf16.msra.mxu0 %v1403_v10  ;;  %v730_v9 = vrot.slane %v1349_v6, %v1631_v27  ;;  %v734_v10 = vrot.slane %v1349_v6, %v1638_v30 }
  0xbc   : > { %v418_v13 = vsel %vm1822_vm8, %v411_v12, %v413_v11  ;;  %v435_v18 = vld [vmem:[#allocation2 + $0x40] sm:$0xff] }
  0xbd   : > { %424 = vst [vmem:[#allocation2 + $0x68] sm:$0xf] %v418_v13 }
  0xbf   : > { %v415_v14 = vpop.permute.xlu1 %414  ;;  %v409_v15 = vpop.permute.xlu0 %408 }
  0xc0   : > { %v419_v16 = vsel %vm1822_vm8, %v413_v11, %v415_v14  ;;  %v417_v17 = vsel %vm1822_vm8, %v409_v15, %v411_v12  ;;  %v438_v19 = vld [vmem:[#allocation2 + $0x58] sm:$0xff]  ;;  %v739_v11 = vcombine.low %v730_v9, %v734_v10  ;;  %v1350_v12 = vld [vmem:[%s1814_s0 + $0x3] ss:$4 sm:$0x7] }
  0xc1   : > { %425 = vst [vmem:[#allocation2 + $0x70] sm:$0xf] %v419_v16  ;;  %423 = vst [vmem:[#allocation2 + $0x60] sm:$0xf] %v417_v17  ;;  %v1409_v20 = vpack.c.bf16 %v438_v19, %v435_v18  ;;  %v772_v13 = vrot.slane %v1350_v12, %v1631_v27  ;;  %v776_v14 = vrot.slane %v1350_v12, %v1638_v30 }
  0xc2   : > { %v1685_v16 = vld [vmem:[%s1814_s0 + $0x1] ss:$4 sm:$0x7] }
  0xc3   : > { %1410 = vmatpush3.bf16.msra.mxu1 %v1409_v20  ;;  %v781_v15 = vcombine.low %v772_v13, %v776_v14  ;;  %v702_v17 = vrot.slane %v1685_v16, %v1631_v27  ;;  %v706_v18 = vrot.slane %v1685_v16, %v1638_v30 }
  0xc4   : > { %v440_v21 = vld [vmem:[#allocation2 + $0x68] sm:$0xf]  ;;  %1379 = vmatprep.subr.mxu1 %v1492_v8 }
  0xc5   : > { %1343 = vmatprep.subr.msk.mxu0 %vm1821_vm9, %v440_v21  ;;  %v711_v19 = vcombine.low %v702_v17, %v706_v18 }
  0xc8   : > { %v439_v23 = vld [vmem:[#allocation2 + $0x60] sm:$0xf]  ;;  %v441_v24 = vld [vmem:[#allocation2 + $0x70] sm:$0xf] }
  0xc9   : > { %1344 = vmatpush1.msk.msra.mxu0 %vm1821_vm9, %v439_v23  ;;  %1380 = vmatpush3.msk.msra.mxu1 %vm1821_vm9, %v441_v24 }
  0xca   : > { %1345 = vmatmul.mubr.msk.f32.vlgmr.msra.gmra.mrb[0].mxu0 %vm1820_vm10, %v426_v22  ;;  %1382 = vmatmul.mubr.msk.f32.vlgmr.msra.gmra.mrb[0].mxu1 %vm1820_vm10, %v426_v22 }
  0xcb   : > { %1419 = vmatprep.subr.bf16.mxu1 %v1487_v7  ;;  %1123 = vmatprep.mubr.f32.mxu0 %v1492_v8 }
  0xcc   : > { %1394 = vmatprep.mubr.msk.f32.mxu1 %vm1494_vm0, %v1492_v8  ;;  %vm689_vm0 = vcmask 64516  }
  0xcd   : > { %vm690_vm10 = vmor %vm689_vm0, %vm1821_vm9  ;;  %vm836_vm0 = vcmask 310276  }
 0x19d   : > { %v1649_v34 = vpop.f32.mrb[0].mxu0  ;;  %v1651_v35 = vpop.f32.mrb[0].mxu1 }
 0x19e   : > { %v614_v36 = vmul.f32 %v1641_v31, %v1649_v34  ;;  %v1655_v37 = vpop.f32.mrb[1].mxu0  ;;  %v616_v38 = vmul.f32 %v1644_v32, %v1651_v35  ;;  %v1383_v39 = vpop.f32.mrb[1].mxu1 }
 0x19f   : > { %v615_v40 = vmul.f32 %v1647_v33, %v1655_v37  ;;  %v738_v39 = vrot.slane %v1349_v6, %v1633_v28 }
 0x1a0   : > { %v617_v41 = vsel %vm1821_vm9, %v614_v36, 0.0  ;;  %v624_v42 = vmul.f32 %v614_v36, %v614_v36  ;;  %v626_v43 = vmul.f32 %v616_v38, %v616_v38  ;;  %v620_v46 = vsel %vm1821_vm9, %v616_v38, 0.0 }
 0x1a1   : > { %v618_v44 = vsel %vm1821_vm9, %v615_v40, 0.0  ;;  %v625_v45 = vmul.f32 %v615_v40, %v615_v40 }
 0x1a2   : > { %v619_v47 = vadd.f32 %v618_v44, %v617_v41  ;;  %v627_v48 = vsel %vm1821_vm9, %v624_v42, 0.0  ;;  %v630_v50 = vsel %vm1821_vm9, %v626_v43, 0.0 }
 0x1a3   : > { %v628_v49 = vsel %vm1821_vm9, %v625_v45, 0.0 }
 0x1a4   : > { %v621_v51 = vadd.f32 %v620_v46, %v619_v47  ;;  %v629_v52 = vadd.f32 %v628_v49, %v627_v48 }
 0x1a6   : > { %622 = vadd.xlane.f32.xlu0 %v621_v51  ;;  %v631_v53 = vadd.f32 %v630_v50, %v629_v52 }
 0x1a8   : > { %632 = vadd.xlane.f32.xlu1 %v631_v53 }
 0x233   : > { %v623_v55 = vpop.xlane.xlu0 %622 }
 0x234   : > { %v634_v56 = vmul.f32 0.00390625, %v623_v55  ;;  %v710_v55 = vrot.slane %v1685_v16, %v1633_v28 }
 0x235   : > { %v633_v57 = vpop.xlane.xlu1 %632 }
 0x236   : > { %v636_v58 = vmul.f32 %v634_v56, %v634_v56  ;;  %v635_v59 = vmul.f32 0.00390625, %v633_v57 }
 0x238   : > { %v637_v60 = vsub.f32 %v635_v59, %v636_v58 }
 0x23a   : > { %v638_v61 = vmax.f32 %v637_v60, 0.0 }
 0x23c   : > { %v639_v62 = vadd.f32 1e-05, %v638_v61 }
 0x23e   : > { %1472 = vrsqrt.f32 %v639_v62 }
 0x248   : > { %v1473_v1 = vpop.eup %1472 }
 0x249   : > { %v641_v2 = vmul.f32 %v1473_v1, %v597_v0 }
 0x24b   : > { %650 = vperm.xlu1 %1458, %v641_v2   ;;  %v642_v3 = vmul.f32 %v641_v2, %v634_v56 }
 0x24d   : > { %644 = vrot.lane.b32.xlu0 %v642_v3, %s1497_s13 }
 0x2bf   : > { %v645_v4 = vpop.permute.xlu0 %644 }
 0x2c0   : > { %v647_v5 = vsub.f32 %v597_v0, %v645_v4 }
 0x2c2   : > { %658 = vperm.xlu0 %1459, %v647_v5  }
 0x2c6   : > { %740 = vrot.lane.b32.xlu0 %v739_v11, %s1498_s20 }
 0x2ca   : > { %782 = vrot.lane.b32.xlu0 %v781_v15, %s1499_s7  ;;  %v651_v20 = vpop.permute.xlu1 %650 }
 0x2cb   : > { %v653_v21 = vmul.f32 %v651_v20, %v1649_v34  ;;  %v654_v22 = vmul.f32 %v651_v20, %v1655_v37  ;;  %v655_v26 = vmul.f32 %v651_v20, %v1651_v35  ;;  %v780_v34 = vrot.slane %v1350_v12, %v1633_v28 }
 0x2ce   : > { %712 = vrot.lane.b32.xlu0 %v711_v19, %s1500_s8 }
 0x341   : > { %v659_v23 = vpop.permute.xlu0 %658 }
 0x342   : > { %v661_v24 = vadd.f32 %v659_v23, %v653_v21  ;;  %v662_v25 = vadd.f32 %v659_v23, %v654_v22  ;;  %v663_v30 = vadd.f32 %v659_v23, %v655_v26 }
 0x344   : > { %v664_v27 = vmax.f32 %v661_v24, 0.0  ;;  %v665_v29 = vmax.f32 %v662_v25, 0.0  ;;  %v666_v38 = vmax.f32 %v663_v30, 0.0 }
 0x345   : > { %v741_v41 = vpop.permute.xlu0 %740 }
 0x346   : > { %v672_v36 = vcombine.low %v664_v27, %v665_v29  ;;  %v744_v43 = vrot.slane %v741_v41, 4 }
 0x348   : > { %673 = vrot.lane.b32.xlu1 %v672_v36, %s1501_s9  ;;  %v746_v48 = vsel %vm745_vm11, %v744_v43, %v741_v41 }
 0x349   : > { %v783_v51 = vpop.permute.xlu0 %782 }
 0x34a   : > { %v786_v52 = vrot.slane %v783_v51, 4 }
 0x34c   : > { %675 = vrot.lane.b32.xlu1 %v666_v38, %s1501_s9  ;;  %v788_v59 = vsel %vm787_vm12, %v786_v52, %v783_v51 }
 0x34d   : > { %v713_v62 = vpop.permute.xlu0 %712 }
 0x34e   : > { %v716_v0 = vrot.slane %v713_v62, 4 }
 0x350   : > { %742 = vrot.lane.b32.xlu1 %v738_v39, %s1498_s20 }
 0x354   : > { %784 = vrot.lane.b32.xlu1 %v780_v34, %s1499_s7 }
 0x3ba   : > { %v674_v37 = vpop.permute.xlu1 %673 }
 0x3bb   : > { %v677_v35 = vrot.slane %v674_v37, 4 }
 0x3bd   : > { %v680_v40 = vsel %vm679_vm14, %v677_v35, %v674_v37 }
 0x3be   : > { %688 = vst.msk [vmem:[#allocation3] sm:$0xff] %vm687_vm15, %v680_v40  ;;  %v676_v42 = vpop.permute.xlu1 %675  ;;  %vm835_vm15 = vcmask 1044000  }
 0x3bf   : > { %v678_v44 = vrot.slane %v676_v42, 4  ;;  %vm837_vm8 = vmor %vm836_vm0, %vm835_vm15 }
 0x3c1   : > { %v681_v45 = vsel %vm1821_vm9, %v677_v35, %v678_v44 }
 0x3c2   : > { %v682_v46 = vsel %vm679_vm14, %v681_v45, %v676_v42  ;;  %v743_v47 = vpop.permute.xlu1 %742  ;;  %vm801_vm14 = vcmask 15360  }
 0x3c3   : > { %691 = vst.msk [vmem:[#allocation3 + $0x8] sm:$0xff] %vm690_vm10, %v682_v46  ;;  %v747_v53 = vsel %vm745_vm11, %v744_v43, %v743_v47  ;;  %vm717_vm10 = vcmask 56320   ;;  %vm820_vm11 = vcmask 89088  }
 0x3c4   : > { %v718_v28 = vsel %vm717_vm10, %v716_v0, %v713_v62 }
 0x3c5   : > { %v694_v49 = vld [vmem:[#allocation3] sm:$0xff] }
 0x3c6   : > { %v750_v50 = vmul.f32 %v746_v48, %v694_v49  ;;  %v785_v54 = vpop.permute.xlu1 %784  ;;  %v792_v61 = vmul.f32 %v788_v59, %v694_v49  ;;  %v722_v9 = vmul.f32 %v718_v28, %v694_v49 }
 0x3c7   : > { %v789_v58 = vsel %vm787_vm12, %v786_v52, %v785_v54  ;;  %vm825_vm12 = vcmask 1043600  }
 0x3c8   : > { %754 = vrot.lane.b32.xlu1 %v750_v50, %s1484_s24  ;;  %vm826_vm6 = vmor %vm686_vm13, %vm825_vm12  ;;  %vm1832_vm13 = vcmask 293888  }
 0x3c9   : > { %vm1834_vm0 = vmmov %vm1832_vm13 }
 0x3ca   : > { %v695_v56 = vld [vmem:[#allocation3 + $0x8] sm:$0xf] }
 0x3cb   : > { %v751_v57 = vmul.f32 %v747_v53, %v695_v56  ;;  %v793_v60 = vmul.f32 %v789_v58, %v695_v56 }
 0x3cc   : > { %714 = vrot.lane.b32.xlu1 %v710_v55, %s1500_s8 }
 0x3cd   : > { %756 = vrot.lane.b32.xlu0 %v751_v57, %s1484_s24 }
 0x3d0   : > { %798 = vrot.lane.b32.xlu1 %v793_v60, %s1502_s10 }
 0x3d1   : > { %796 = vrot.lane.b32.xlu0 %v792_v61, %s1502_s10 }
 0x43a   : > { %v755_v63 = vpop.permute.xlu1 %754 }
 0x43b   : > { %v758_v4 = vrot.slane %v755_v63, 4 }
 0x43e   : > { %v715_v1 = vpop.permute.xlu1 %714 }
 0x43f   : > { %v719_v2 = vsel %vm717_vm10, %v716_v0, %v715_v1  ;;  %v757_v3 = vpop.permute.xlu0 %756  ;;  %vm828_vm10 = vcmask 404480  }
 0x440   : > { %v759_v5 = vrot.slane %v757_v3, 4  ;;  %v723_v6 = vmul.f32 %v719_v2, %v695_v56 }
 0x442   : > { %v760_v10 = vsel %vm1821_vm9, %v758_v4, %v759_v5  ;;  %v765_v15 = vadd.f32 %v757_v3, %v723_v6  ;;  %v799_v16 = vpop.permute.xlu1 %798  ;;  %vm833_vm9 = vcmask 552336  }
 0x443   : > { %v761_v11 = vsel %vm272_vm1, %v755_v63, %v760_v10  ;;  %v797_v12 = vpop.permute.xlu0 %796 }
 0x444   : > { %v764_v13 = vadd.f32 %v761_v11, %v722_v9  ;;  %v800_v14 = vrot.slane %v797_v12, 4 }
 0x446   : > { %v802_v17 = vsel %vm801_vm14, %v800_v14, %v797_v12  ;;  %v803_v18 = vsel %vm801_vm14, %v800_v14, %v799_v16  ;;  %vm812_vm14 = vcmask 142336  }
 0x447   : > { %v806_v19 = vadd.f32 %v802_v17, %v764_v13  ;;  %v807_v20 = vadd.f32 %v803_v18, %v765_v15 }
 0x449   : > { %817 = vrot.lane.b32.xlu1 %v807_v20, %s1503_s11  ;;  %815 = vrot.lane.b32.xlu0 %v806_v19, %s1503_s11 }
 0x44d   : > { %830 = vrot.lane.b32.xlu1 %v807_v20, %s1504_s12  ;;  %809 = vrot.lane.b32.xlu0 %v806_v19, %s1505_s14 }
 0x4bb   : > { %v818_v21 = vpop.permute.xlu1 %817  ;;  %v816_v22 = vpop.permute.xlu0 %815 }
 0x4bc   : > { %v819_v23 = vrot.slane %v816_v22, 4 }
 0x4be   : > { %v822_v24 = vsel %vm820_vm11, %v819_v23, %v818_v21  ;;  %v821_v27 = vsel %vm820_vm11, %v819_v23, %v816_v22 }
 0x4bf   : > { %v831_v25 = vpop.permute.xlu1 %830  ;;  %829 = vst.msk [vmem:[#allocation4 + $0x8] sm:$0xf] %vm828_vm10, %v822_v24  ;;  %v810_v26 = vpop.permute.xlu0 %809 }
 0x4c0   : > { %834 = vst.msk [vmem:[#allocation4 + $0x8] sm:$0xf] %vm833_vm9, %v831_v25 }
 0x4c1   : > { %813 = vst.msk [vmem:[#allocation4] sm:$0xf] %vm812_vm14, %v810_v26 }
 0x4c2   : > { %838 = vst.msk [vmem:[#allocation4 + $0x8] sm:$0xff] %vm837_vm8, %v1492_v8 }
 0x4c3   : > { %827 = vst.msk [vmem:[#allocation4] sm:$0xff] %vm826_vm6, %v821_v27  ;;  %vm1824_vm6 = vcmask 752640  }
 0x4c4   : > { %vm1825_vm8 = vmmov %vm1824_vm6 }
 0x4c9   : > { %v840_v29 = vld [vmem:[#allocation4 + $0x8] sm:$0xf] }
 0x4ca   : > { %v839_v30 = vld [vmem:[#allocation4] sm:$0xff]  ;;  %846 = vst [vmem:[#allocation2 + $0x10] sm:$0xf] %v840_v29  ;;  %v871_v38 = vld [vmem:[#allocation4 + $0x8] sm:$0xff] }
 0x4cb   : > { %v842_v36 = vcombine.high %v839_v30, %v839_v30  ;;  %844 = vst [vmem:[#allocation2] sm:$0xf] %v839_v30  ;;  %876 = vrot.lane.b32.xlu1 %v839_v30, %s1484_s24  ;;  %855 = vrot.lane.b32.xlu0 %v839_v30, %s1485_s25  ;;  %v851_v39 = vcombine.low %v839_v30, %v839_v30 }
 0x4cc   : > { %v852_v34 = vcombine.low %v871_v38, %v871_v38  ;;  %v875_v37 = vcombine.high %v871_v38, %v871_v38 }
 0x4cd   : > { %845 = vst [vmem:[#allocation2 + $0x8] sm:$0xf] %v842_v36 }
 0x4cf   : > { %880 = vrot.lane.b32.xlu1 %v871_v38, %s1484_s24  ;;  %901 = vrot.lane.b32.xlu0 %v839_v30, %s1486_s26 }
 0x4d3   : > { %859 = vrot.lane.b32.xlu1 %v871_v38, %s1485_s25  ;;  %947 = vrot.lane.b32.xlu0 %v839_v30, %s1489_s28 }
 0x4d7   : > { %905 = vrot.lane.b32.xlu1 %v871_v38, %s1486_s26  ;;  %993 = vrot.lane.b32.xlu0 %v839_v30, %s1491_s30 }
 0x4db   : > { %926 = vrot.lane.b32.xlu1 %v871_v38, %s1488_s27  ;;  %922 = vrot.lane.b32.xlu0 %v839_v30, %s1488_s27 }
 0x4df   : > { %972 = vrot.lane.b32.xlu1 %v871_v38, %s1490_s29  ;;  %968 = vrot.lane.b32.xlu0 %v839_v30, %s1490_s29 }
 0x4e3   : > { %945 = vrot.lane.b32.xlu1 %v851_v39, %s1489_s28  ;;  %878 = vrot.lane.b32.xlu0 %v842_v36, %s1484_s24 }
 0x4e7   : > { %991 = vrot.lane.b32.xlu1 %v851_v39, %s1491_s30  ;;  %853 = vrot.lane.b32.xlu0 %v851_v39, %s1485_s25 }
 0x4eb   : > { %951 = vrot.lane.b32.xlu1 %v871_v38, %s1489_s28  ;;  %899 = vrot.lane.b32.xlu0 %v851_v39, %s1486_s26 }
 0x4ef   : > { %857 = vrot.lane.b32.xlu1 %v852_v34, %s1485_s25  ;;  %924 = vrot.lane.b32.xlu0 %v842_v36, %s1488_s27 }
 0x4f3   : > { %903 = vrot.lane.b32.xlu1 %v852_v34, %s1486_s26  ;;  %970 = vrot.lane.b32.xlu0 %v842_v36, %s1490_s29 }
 0x4f7   : > { %949 = vrot.lane.b32.xlu1 %v852_v34, %s1489_s28  ;;  %882 = vrot.lane.b32.xlu0 %v875_v37, %s1484_s24 }
 0x4fb   : > { %995 = vrot.lane.b32.xlu1 %v852_v34, %s1491_s30  ;;  %1016 = vrot.lane.b32.xlu0 %v842_v36, %s1493_s6 }
 0x4ff   : > { %997 = vrot.lane.b32.xlu1 %v871_v38, %s1491_s30  ;;  %928 = vrot.lane.b32.xlu0 %v875_v37, %s1488_s27 }
 0x503   : > { %1018 = vrot.lane.b32.xlu1 %v871_v38, %s1493_s6  ;;  %974 = vrot.lane.b32.xlu0 %v875_v37, %s1490_s29  ;;  %s1425_s29 = smul.u32 12, %s1842_s19 }
 0x507   : > { %1020 = vrot.lane.b32.xlu1 %v875_v37, %s1493_s6  ;;  %1014 = vrot.lane.b32.xlu0 %v839_v30, %s1493_s6  ;;  %s224_s6 = scalar_lea.vmem %s1819_s5, %s1425_s29 }
 0x53d   : > { %v877_v35 = vpop.permute.xlu1 %876  ;;  %v856_v40 = vpop.permute.xlu0 %855 }
 0x541   : > { %v881_v41 = vpop.permute.xlu1 %880  ;;  %v902_v42 = vpop.permute.xlu0 %901 }
 0x545   : > { %v860_v43 = vpop.permute.xlu1 %859  ;;  %v948_v44 = vpop.permute.xlu0 %947 }
 0x549   : > { %v906_v45 = vpop.permute.xlu1 %905  ;;  %v994_v46 = vpop.permute.xlu0 %993 }
 0x54d   : > { %v1743_v47 = vpop.permute.xlu1 %926  ;;  %v923_v48 = vpop.permute.xlu0 %922 }
 0x551   : > { %v1745_v49 = vpop.permute.xlu1 %972  ;;  %v969_v50 = vpop.permute.xlu0 %968 }
 0x555   : > { %v946_v51 = vpop.permute.xlu1 %945  ;;  %v879_v52 = vpop.permute.xlu0 %878 }
 0x556   : > { %v953_v53 = vsel %vm344_vm5, %v946_v51, %v948_v44  ;;  %v884_v54 = vsel %vm272_vm1, %v877_v35, %v879_v52  ;;  %v885_v55 = vsel %vm272_vm1, %v879_v52, %v881_v41 }
 0x557   : > { %959 = vst [vmem:[#allocation2 + $0x30] sm:$0xf0] %v953_v53  ;;  %890 = vst [vmem:[#allocation2 + $0x18] sm:$0xf] %v884_v54  ;;  %v1031_v54 = vld [vmem:[%s1817_s3] sm:$0xf] }
 0x558   : > { %891 = vst [vmem:[#allocation2 + $0x20] sm:$0xf] %v885_v55 }
 0x559   : > { %v992_v56 = vpop.permute.xlu1 %991  ;;  %v854_v57 = vpop.permute.xlu0 %853 }
 0x55a   : > { %v999_v58 = vsel %vm392_vm7, %v992_v56, %v994_v46  ;;  %v861_v59 = vsel %vm248_vm3, %v854_v57, %v856_v40 }
 0x55b   : > { %1005 = vst [vmem:[#allocation2 + $0x48] sm:$0xf0] %v999_v58  ;;  %867 = vst [vmem:[#allocation2] sm:$0xf0] %v861_v59 }
 0x55d   : > { %v952_v60 = vpop.permute.xlu1 %951  ;;  %v900_v61 = vpop.permute.xlu0 %899 }
 0x55e   : > { %v907_v62 = vsel %vm296_vm2, %v900_v61, %v902_v42 }
 0x55f   : > { %913 = vst [vmem:[#allocation2 + $0x18] sm:$0xf0] %v907_v62 }
 0x561   : > { %v858_v63 = vpop.permute.xlu1 %857  ;;  %v925_v0 = vpop.permute.xlu0 %924 }
 0x562   : > { %v862_v1 = vsel %vm248_vm3, %v856_v40, %v858_v63  ;;  %v863_v28 = vsel %vm248_vm3, %v858_v63, %v860_v43  ;;  %v930_v2 = vsel %vm320_vm4, %v923_v48, %v925_v0  ;;  %v931_v3 = vsel %vm320_vm4, %v925_v0, %v1743_v47  ;;  %v1032_v24 = vld [vmem:[#allocation2] sm:$0xff] }
 0x563   : > { %868 = vst [vmem:[#allocation2 + $0x8] sm:$0xf0] %v862_v1  ;;  %869 = vst [vmem:[#allocation2 + $0x10] sm:$0xf0] %v863_v28 }
 0x564   : > { %936 = vst [vmem:[#allocation2 + $0x30] sm:$0xf] %v930_v2  ;;  %937 = vst [vmem:[#allocation2 + $0x38] sm:$0xf] %v931_v3 }
 0x565   : > { %v904_v4 = vpop.permute.xlu1 %903  ;;  %v971_v5 = vpop.permute.xlu0 %970 }
 0x566   : > { %v908_v6 = vsel %vm296_vm2, %v902_v42, %v904_v4  ;;  %v909_v9 = vsel %vm296_vm2, %v904_v4, %v906_v45  ;;  %v976_v10 = vsel %vm1824_vm6, %v969_v50, %v971_v5  ;;  %v977_v11 = vsel %vm1825_vm8, %v971_v5, %v1745_v49  ;;  %v1035_v19 = vld [vmem:[#allocation2 + $0x18] sm:$0xff]  ;;  %vm1827_vm2 = vmmov %vm1824_vm6 }
 0x567   : > { %914 = vst [vmem:[#allocation2 + $0x20] sm:$0xf0] %v908_v6  ;;  %915 = vst [vmem:[#allocation2 + $0x28] sm:$0xf0] %v909_v9  ;;  %v1413_v25 = vpack.c.bf16 %v1035_v19, %v1032_v24  ;;  %v1507_v19 = vmov 3   ;;  %v1251_v24 = vld [vmem:[%s1552_s23] sm:$0xff] }
 0x568   : > { %982 = vst [vmem:[#allocation2 + $0x48] sm:$0xf] %v976_v10  ;;  %983 = vst [vmem:[#allocation2 + $0x50] sm:$0xf] %v977_v11  ;;  %1461 = vset.pattern.permute.xlu0 %v1507_v19 }
 0x569   : > { %v950_v12 = vpop.permute.xlu1 %949  ;;  %v883_v13 = vpop.permute.xlu0 %882 }
 0x56a   : > { %v954_v14 = vsel %vm344_vm5, %v948_v44, %v950_v12  ;;  %v955_v15 = vsel %vm344_vm5, %v950_v12, %v952_v60  ;;  %v886_v16 = vsel %vm272_vm1, %v881_v41, %v883_v13  ;;  %v1033_v21 = vld [vmem:[#allocation2 + $0x8] sm:$0xff]  ;;  %v1034_v36 = vld [vmem:[#allocation2 + $0x10] sm:$0xff]  ;;  %vm1826_vm1 = vcmask 736256  }
 0x56b   : > { %960 = vst [vmem:[#allocation2 + $0x38] sm:$0xf0] %v954_v14  ;;  %961 = vst [vmem:[#allocation2 + $0x40] sm:$0xf0] %v955_v15  ;;  %v1038_v45 = vld [vmem:[#allocation2 + $0x30] sm:$0xff] }
 0x56c   : > { %892 = vst [vmem:[#allocation2 + $0x28] sm:$0xf] %v886_v16  ;;  %vm1828_vm3 = vmmov %vm1826_vm1 }
 0x56d   : > { %v996_v17 = vpop.permute.xlu1 %995  ;;  %v1017_v18 = vpop.permute.xlu0 %1016  ;;  %vm1829_vm5 = vmmov %vm1826_vm1 }
 0x56e   : > { %v1000_v20 = vsel %vm392_vm7, %v994_v46, %v996_v17  ;;  %v1036_v22 = vld [vmem:[#allocation2 + $0x20] sm:$0xff] }
 0x56f   : > { %1006 = vst [vmem:[#allocation2 + $0x50] sm:$0xf0] %v1000_v20  ;;  %v1411_v23 = vpack.c.bf16 %v1036_v22, %v1033_v21  ;;  %v1041_v35 = vld [vmem:[#allocation2 + $0x48] sm:$0xff]  ;;  %v1200_v20 = vld [vmem:[%s1818_s4] sm:$0xf] }
 0x570   : > { %v1417_v46 = vpack.c.bf16 %v1041_v35, %v1038_v45 }
 0x571   : > { %v998_v26 = vpop.permute.xlu1 %997  ;;  %v929_v27 = vpop.permute.xlu0 %928  ;;  %1412 = vmatprep.subr.bf16.mxu0 %v1411_v23 }
 0x572   : > { %v1001_v29 = vsel %vm392_vm7, %v996_v17, %v998_v26  ;;  %v932_v30 = vsel %vm320_vm4, %v1743_v47, %v929_v27  ;;  %1414 = vmatpush1.bf16.msra.mxu0 %v1413_v25  ;;  %v1039_v42 = vld [vmem:[#allocation2 + $0x38] sm:$0xff]  ;;  %vm1830_vm7 = vcmask 1043456   ;;  %v1255_v25 = vcombine.high %v1251_v24, %v1251_v24  ;;  %v1252_v26 = vld [vmem:[%s1552_s23 + $0x8] sm:$0xff] }
 0x573   : > { %v1037_v38 = vld [vmem:[#allocation2 + $0x28] sm:$0xff]  ;;  %1007 = vst [vmem:[#allocation2 + $0x58] sm:$0xf0] %v1001_v29  ;;  %938 = vst [vmem:[#allocation2 + $0x40] sm:$0xf] %v932_v30  ;;  %v1256_v27 = vcombine.high %v1252_v26, %v1252_v26 }
 0x574   : > { %v1420_v39 = vpack.c.bf16 %v1037_v38, %v1034_v36  ;;  %vm1831_vm9 = vmmov %vm1830_vm7 }
 0x575   : > { %v1019_v34 = vpop.permute.xlu1 %1018  ;;  %v975_v37 = vpop.permute.xlu0 %974  ;;  %vm1833_vm15 = vmmov %vm1830_vm7 }
 0x576   : > { %1421 = vmatpush3.bf16.msra.mxu1 %v1420_v39  ;;  %v1023_v40 = vsel %vm1826_vm1, %v1017_v18, %v1019_v34  ;;  %v978_v41 = vsel %vm1827_vm2, %v1745_v49, %v975_v37  ;;  %v1042_v43 = vld [vmem:[#allocation2 + $0x50] sm:$0xff]  ;;  %vm1835_vm11 = vmmov %vm1830_vm7 }
 0x577   : > { %1422 = vmatprep.subr.bf16.mxu1 %v1487_v7  ;;  %1029 = vst [vmem:[#allocation2 + $0x68] sm:$0xf] %v1023_v40  ;;  %984 = vst [vmem:[#allocation2 + $0x58] sm:$0xf] %v978_v41  ;;  %v1415_v44 = vpack.c.bf16 %v1042_v43, %v1039_v42 }
 0x578   : > { %vm1836_vm12 = vmmov %vm1830_vm7 }
 0x579   : > { %v1021_v47 = vpop.permute.xlu1 %1020  ;;  %v1015_v48 = vpop.permute.xlu0 %1014  ;;  %1416 = vmatprep.subr.bf16.mxu0 %v1415_v44  ;;  %vm1837_vm10 = vmmov %vm1830_vm7 }
 0x57a   : > { %v1024_v50 = vsel %vm1828_vm3, %v1019_v34, %v1021_v47  ;;  %v1022_v51 = vsel %vm1829_vm5, %v1015_v48, %v1017_v18  ;;  %1418 = vmatpush1.bf16.msra.mxu0 %v1417_v46  ;;  %v1040_v52 = vld [vmem:[#allocation2 + $0x40] sm:$0xff]  ;;  %vm1838_vm14 = vmmov %vm1830_vm7 }
 0x57b   : > { %1030 = vst [vmem:[#allocation2 + $0x70] sm:$0xf] %v1024_v50  ;;  %1028 = vst [vmem:[#allocation2 + $0x60] sm:$0xf] %v1022_v51 }
 0x57c   : > { %vm1839_vm6 = vmmov %vm1830_vm7 }
 0x57d   : > { %vm1840_vm8 = vmmov %vm1839_vm6 }
 0x57e   : > { %v1045_v49 = vld [vmem:[#allocation2 + $0x68] sm:$0xf]  ;;  %v1043_v53 = vld [vmem:[#allocation2 + $0x58] sm:$0xff] }
 0x57f   : > { %1351 = vmatprep.subr.msk.mxu0 %vm1830_vm7, %v1045_v49  ;;  %v1423_v7 = vpack.c.bf16 %v1043_v53, %v1040_v52 }
 0x581   : > { %1424 = vmatpush3.bf16.msra.mxu1 %v1423_v7 }
 0x582   : > { %v1044_v55 = vld [vmem:[#allocation2 + $0x60] sm:$0xf]  ;;  %1392 = vmatprep.subr.mxu1 %v1492_v8  ;;  %v1046_v56 = vld [vmem:[#allocation2 + $0x70] sm:$0xf] }
 0x583   : > { %1352 = vmatpush1.msk.msra.mxu0 %vm1831_vm9, %v1044_v55 }
 0x584   : > { %1353 = vmatmul.mubr.msk.f32.vlgmr.msra.gmra.mrb[2].mxu0 %vm1832_vm13, %v1031_v54 }
 0x585   : > { %1393 = vmatpush3.msk.msra.mxu1 %vm1833_vm15, %v1046_v56 }
 0x586   : > { %1395 = vmatmul.mubr.msk.f32.vlgmr.msra.gmra.mrb[2].mxu1 %vm1834_vm0, %v1031_v54 }
 0x657   : > { %v1125_v57 = vpop.f32.mrb[2].mxu0 }
 0x658   : > { %v1201_v58 = vmul.f32 %v1125_v57, %v1641_v31  ;;  %v1127_v59 = vpop.f32.mrb[3].mxu0 }
 0x659   : > { %v1202_v60 = vmul.f32 %v1127_v59, %v1647_v33  ;;  %v1196_v61 = vpop.f32.mrb[2].mxu1 }
 0x65a   : > { %v1204_v62 = vsel %vm1835_vm11, %v1201_v58, 0.0  ;;  %v1211_v63 = vmul.f32 %v1201_v58, %v1201_v58  ;;  %v1203_v8 = vmul.f32 %v1196_v61, %v1644_v32  ;;  %v1396_v0 = vpop.f32.mrb[3].mxu1  ;;  %v1506_v32 = vmov 2  }
 0x65b   : > { %v1205_v1 = vsel %vm1836_vm12, %v1202_v60, 0.0  ;;  %v1212_v28 = vmul.f32 %v1202_v60, %v1202_v60  ;;  %1460 = vset.pattern.permute.xlu1 %v1506_v32 }
 0x65c   : > { %v1213_v2 = vmul.f32 %v1203_v8, %v1203_v8  ;;  %v1206_v3 = vadd.f32 %v1205_v1, %v1204_v62  ;;  %v1207_v4 = vsel %vm1837_vm10, %v1203_v8, 0.0  ;;  %v1214_v5 = vsel %vm1838_vm14, %v1211_v63, 0.0 }
 0x65d   : > { %v1215_v31 = vsel %vm1839_vm6, %v1212_v28, 0.0 }
 0x65e   : > { %v1208_v6 = vadd.f32 %v1207_v4, %v1206_v3  ;;  %v1216_v33 = vadd.f32 %v1215_v31, %v1214_v5  ;;  %v1217_v9 = vsel %vm1840_vm8, %v1213_v2, 0.0 }
 0x660   : > { %1209 = vadd.xlane.f32.xlu0 %v1208_v6  ;;  %v1218_v10 = vadd.f32 %v1217_v9, %v1216_v33 }
 0x662   : > { %1219 = vadd.xlane.f32.xlu1 %v1218_v10 }
 0x6ed   : > { %v1210_v11 = vpop.xlane.xlu0 %1209 }
 0x6ee   : > { %v1221_v12 = vmul.f32 0.00390625, %v1210_v11 }
 0x6ef   : > { %v1220_v13 = vpop.xlane.xlu1 %1219 }
 0x6f0   : > { %v1223_v14 = vmul.f32 %v1221_v12, %v1221_v12  ;;  %v1222_v15 = vmul.f32 0.00390625, %v1220_v13 }
 0x6f2   : > { %v1224_v16 = vsub.f32 %v1222_v15, %v1223_v14 }
 0x6f4   : > { %v1225_v17 = vmax.f32 %v1224_v16, 0.0 }
 0x6f6   : > { %v1226_v18 = vadd.f32 1e-05, %v1225_v17 }
 0x6f8   : > { %1474 = vrsqrt.f32 %v1226_v18 }
 0x702   : > { %v1475_v21 = vpop.eup %1474 }
 0x703   : > { %v1228_v22 = vmul.f32 %v1475_v21, %v1200_v20 }
 0x705   : > { %1237 = vperm.xlu1 %1460, %v1228_v22   ;;  %v1229_v23 = vmul.f32 %v1228_v22, %v1221_v12 }
 0x707   : > { %1231 = vrot.lane.b32.xlu0 %v1229_v23, %s1497_s13 }
 0x709   : > { %1257 = vrot.lane.b32.xlu1 %v1251_v24, %s1488_s27 }
 0x70d   : > { %1259 = vrot.lane.b32.xlu1 %v1255_v25, %s1488_s27 }
 0x711   : > { %1263 = vrot.lane.b32.xlu1 %v1256_v27, %s1488_s27 }
 0x779   : > { %v1232_v29 = vpop.permute.xlu0 %1231 }
 0x77a   : > { %v1234_v30 = vsub.f32 %v1200_v20, %v1232_v29 }
 0x77c   : > { %1245 = vperm.xlu0 %1461, %v1234_v30  }
 0x780   : > { %1261 = vrot.lane.b32.xlu0 %v1252_v26, %s1488_s27 }
 0x784   : > { %v1238_v36 = vpop.permute.xlu1 %1237 }
 0x785   : > { %v1240_v34 = vmul.f32 %v1238_v36, %v1125_v57  ;;  %v1241_v35 = vmul.f32 %v1238_v36, %v1127_v59  ;;  %v1242_v40 = vmul.f32 %v1238_v36, %v1196_v61 }
 0x788   : > { %v1258_v38 = vpop.permute.xlu1 %1257 }
 0x78c   : > { %v1260_v39 = vpop.permute.xlu1 %1259 }
 0x78d   : > { %v1265_v46 = vsel %vm320_vm4, %v1258_v38, %v1260_v39 }
 0x790   : > { %v1264_v42 = vpop.permute.xlu1 %1263 }
 0x7fb   : > { %v1246_v37 = vpop.permute.xlu0 %1245 }
 0x7fc   : > { %v1248_v41 = vadd.f32 %v1246_v37, %v1240_v34  ;;  %v1249_v43 = vadd.f32 %v1246_v37, %v1241_v35  ;;  %v1250_v44 = vadd.f32 %v1246_v37, %v1242_v40 }
 0x7fe   : > { %v1271_v50 = vadd.f32 %v1265_v46, %v1248_v41 }
 0x7ff   : > { %v1262_v45 = vpop.permute.xlu0 %1261 }
 0x800   : > { %v1266_v47 = vsel %vm320_vm4, %v1260_v39, %v1262_v45  ;;  %v1267_v48 = vsel %vm320_vm4, %v1262_v45, %v1264_v42 }
 0x801   : > { %v1272_v51 = vadd.f32 %v1266_v47, %v1249_v43  ;;  %v1273_v49 = vadd.f32 %v1267_v48, %v1250_v44 }
 0x803   : > { %v1276_v52 = vcombine.low %v1271_v50, %v1272_v51  ;;  %1279 = vst [vmem:[%s224_s6 + $0x8] sm:$0xf] %v1273_v49 }
 0x805   : > { %1278 = vst [vmem:[%s224_s6] sm:$0xff] %v1276_v52 }
 0x806 PF: > { %s15_s18 = sadd.s32 1, %s1482_s18  }
 0x807   : > { %p12_p4 = scmp.ge.s32.totalorder %s15_s18, 4  }
 0x809   :  { %14 = sbr.rel (!%p12_p4) target bundleno = 1 (0x1), region = 73 }

</bundles_post_ra>
